<compile_context>
chip_gen: v7x
topology: tpu7x:2x2x1
jax: 0.10.0
libtpu: 0.0.40
codegen_flags: <defaults>
</compile_context>

<pallas_src>
import functools

import jax
import jax.numpy as jnp
from jax.experimental import pallas as pl
from jax.experimental.pallas import tpu as pltpu


# ----------------------------------------------------------------------------
# Fused Pallas kernel: all layers of [pad -> conv3x3 -> BN -> LeakyReLU] for a
# block of batch elements, on a lane-dense (batch_block*H, W*C) activation slab.
# ----------------------------------------------------------------------------
def _conv_block_kernel(x_ref, w_ref, t_ref, o_ref, *, H, W, C, num_layers, use_oa):
    # x_ref : (M, W*C)          lane-dense activations, M = batch_block * H
    # w_ref : (L, 9, W*C, W*C)  per-tap block-diagonal weights (BN scale folded)
    # t_ref : (L, 1, W*C)       fused conv-bias + eval-mode BN shift (f32)
    # o_ref : (M, W*C)
    M, WC = x_ref.shape
    assert WC == W * C and M % H == 0
    cdtype = w_ref.dtype

    x = x_ref[...].astype(jnp.float32)

    # --- layer-invariant masks, hoisted (JAX does not CSE broadcasts) ---------
    lane = jax.lax.broadcasted_iota(jnp.int32, (M, WC), 1)
    left_col = lane < C                 # output column w == 0   (reflects to col 1)
    right_col = lane >= WC - C          # output column w == W-1 (reflects to col W-2)
    if M > H:                           # batch-element boundaries inside the block
        row = jax.lax.broadcasted_iota(jnp.int32, (M, WC), 0)
        top_row = functools.reduce(
            jnp.logical_or, [row == b * H for b in range(M // H)])
        bot_row = functools.reduce(
            jnp.logical_or, [row == b * H + H - 1 for b in range(M // H)])

    for l in range(num_layers):
        # --- circular pad along H == sublane rolls (XLU slot, otherwise idle) --
        up = pltpu.roll(x, 1, 0)          # row r <- row r-1
        dn = pltpu.roll(x, M - 1, 0)      # row r <- row r+1
        if M > H:
            # Rows where the global roll crossed a batch-element boundary must
            # instead wrap within their own element.
            up = jnp.where(top_row, pltpu.roll(x, M - H + 1, 0), up)
            dn = jnp.where(bot_row, pltpu.roll(x, H - 1, 0), dn)
        h_views = (up, x, dn)             # dy = 0, 1, 2

        # --- reflect pad along W (lane rolls + one-column fix) + per-tap dots --
        acc = None
        for dy in range(3):
            hv = h_views[dy]
            r_plus = pltpu.roll(hv, C, 1)        # lane l <- lane l-C  (col w-1)
            r_minus = pltpu.roll(hv, WC - C, 1)  # lane l <- lane l+C  (col w+1)
            w_views = (
                jnp.where(left_col, r_minus, r_plus),   # dx = 0: col -1 -> col 1
                hv,                                     # dx = 1
                jnp.where(right_col, r_plus, r_minus),  # dx = 2: col W  -> col W-2
            )
            for dx in range(3):
                tap = jnp.dot(
                    w_views[dx].astype(cdtype),
                    w_ref[l, dy * 3 + dx],
                    preferred_element_type=jnp.float32,
                )
                acc = tap if acc is None else acc + tap   # f32 accumulation

        y = acc + t_ref[l]                                # (1, WC) broadcast shift
        if l < num_layers - 1 or use_oa:
            y = jnp.maximum(y, 0.01 * y)                  # LeakyReLU(0.01)
        x = y

    o_ref[...] = x.astype(o_ref.dtype)


# ----------------------------------------------------------------------------
# Host-side packing: fold conv bias + eval-mode BN into per-tap block weights
# ----------------------------------------------------------------------------
def _pack_params(params, W, eps=1e-5, compute_dtype=jnp.bfloat16):
    C = params[0]["weight"].shape[0]
    eye_w = jnp.eye(W, dtype=jnp.float32)
    w_layers, t_layers = [], []
    for p in params:
        s = p["gamma"] / jnp.sqrt(p["var"] + eps)             # BN scale (C,)
        t = p["beta"] + s * (p["bias"] - p["mean"])           # BN shift (C,)
        # PyTorch (C_out, C_in, 3, 3) -> (ky, kx, C_in, C_out), scale folded in.
        wt = jnp.transpose(p["weight"], (2, 3, 1, 0)).astype(jnp.float32) * s
        taps = []
        for dy in range(3):
            for dx in range(3):
                # Block-diagonal over W: input lane w*C+ci -> output lane w*C+co.
                blk = jnp.einsum("uv,io->uivo", eye_w, wt[dy, dx]).reshape(W * C, W * C)
                taps.append(blk)
        w_layers.append(jnp.stack(taps))                       # (9, WC, WC)
        t_layers.append(jnp.tile(t, W)[None, :])               # (1, WC)
    w = jnp.stack(w_layers).astype(compute_dtype)              # (L, 9, WC, WC)
    t = jnp.stack(t_layers).astype(jnp.float32)                # (L, 1, WC)
    return w, t


def _pick_batch_block(N, H):
    """Batch elements folded per grid step (into the matmul M dimension)."""
    target = -(-128 // H)               # smallest B with B*H >= 128
    if N >= 2 * target:
        # Keep >= 2 grid steps (feed v7x's second TC) while reaching M >= 128.
        for bb in range(N // 2, 0, -1):
            if N % bb == 0 and bb >= target:
                return bb
    return N                            # fold the whole batch into one step


# ----------------------------------------------------------------------------
# ConvBlock forward (Pallas path)
# ----------------------------------------------------------------------------
def conv_block_forward(x_nchw, params, use_oa=False, eps=1e-5,
                       compute_dtype=jnp.bfloat16):
    N, C, H, W = x_nchw.shape
    L = len(params)
    WC = W * C

    w_big, t_big = _pack_params(params, W, eps, compute_dtype)
    # NCHW -> lane-dense (N*H, W*C): lane = w*C + c, row = n*H + h.
    x_flat = jnp.transpose(x_nchw, (0, 2, 3, 1)).reshape(N * H, WC)

    bb = _pick_batch_block(N, H)
    mb = bb * H
    grid = (N // bb,)

    kernel = functools.partial(
        _conv_block_kernel, H=H, W=W, C=C, num_layers=L, use_oa=use_oa)

    out = pl.pallas_call(
        kernel,
        out_shape=jax.ShapeDtypeStruct((N * H, WC), x_nchw.dtype),
        grid=grid,
        in_specs=[
            pl.BlockSpec((mb, WC), lambda i: (i, 0)),
            # Constant-index blocks below; single-buffering them
            # (pipeline_mode=pl.Buffered(1)) only matters when L*9*(W*C)^2
            # starts to approach the VMEM budget.
            pl.BlockSpec((L, 9, WC, WC), lambda i: (0, 0, 0, 0)),
            pl.BlockSpec((L, 1, WC), lambda i: (0, 0, 0)),
        ],
        out_specs=pl.BlockSpec((mb, WC), lambda i: (i, 0)),
        compiler_params=pltpu.CompilerParams(
            dimension_semantics=("parallel",),
            vmem_limit_bytes=32 * 1024 * 1024,
        ),
    )(x_flat, w_big, t_big)

    # lane-dense -> NCHW
    return jnp.transpose(out.reshape(N, H, W, C), (0, 3, 1, 2))


# ----------------------------------------------------------------------------
# Pure-JAX reference for validation
# ----------------------------------------------------------------------------
def conv_block_reference(x_nchw, params, use_oa=False, eps=1e-5):
    x = x_nchw
    L = len(params)
    for i, p in enumerate(params):
        xp = jnp.pad(x,  ((0, 0), (0, 0), (1, 1), (0, 0)), mode="wrap")     # H circular
        xp = jnp.pad(xp, ((0, 0), (0, 0), (0, 0), (1, 1)), mode="reflect")  # W reflect
        y = jax.lax.conv_general_dilated(
            xp, p["weight"], (1, 1), "VALID",
            dimension_numbers=("NCHW", "OIHW", "NCHW"),
        )
        y = y + p["bias"][None, :, None, None]
        s = p["gamma"] / jnp.sqrt(p["var"] + eps)
        y = (s[None, :, None, None] * (y - p["mean"][None, :, None, None])
             + p["beta"][None, :, None, None])
        if i < L - 1 or use_oa:
            y = jnp.where(y >= 0, y, 0.01 * y)
        x = y
    return x


# ----------------------------------------------------------------------------
# Deterministic parameter construction (synthetic, not a checkpoint)
# ----------------------------------------------------------------------------
def make_params(key, num_channels, num_layers):
    params = []
    for _ in range(num_layers):
        key, kw, kb, kg, kbt, km, kv = jax.random.split(key, 7)
        params.append({
            "weight": 0.1 * jax.random.normal(kw, (num_channels, num_channels, 3, 3),
                                              jnp.float32),
            "bias":   0.1 * jax.random.normal(kb, (num_channels,), jnp.float32),
            "gamma":  1.0 + 0.1 * jax.random.normal(kg, (num_channels,), jnp.float32),
            "beta":   0.1 * jax.random.normal(kbt, (num_channels,), jnp.float32),
            "mean":   0.1 * jax.random.normal(km, (num_channels,), jnp.float32),
            "var":    1.0 + 0.1 * jax.random.uniform(kv, (num_channels,), jnp.float32),
        })
    return params


if __name__ == "__main__":
    # TODO(synk): BatchNorm2d is implemented in eval/inference mode (running
    # statistics folded into the conv weights); training-mode batch statistics
    # are not reproduced.
    N, C, H, W = 2, 8, 16, 16           # W*C = 128 -> fully lane-dense slabs
    num_layers = 2
    use_oa = False

    key = jax.random.PRNGKey(0)
    kx, kp = jax.random.split(key)
    x = jax.random.normal(kx, (N, C, H, W), jnp.float32)
    params = make_params(kp, C, num_layers)

    ref = jax.block_until_ready(conv_block_reference(x, params, use_oa=use_oa))

    # Exact (f32) compute path: validates padding / tap / BN-fold indexing tightly.
    out_f32 = jax.block_until_ready(
        conv_block_forward(x, params, use_oa=use_oa, compute_dtype=jnp.float32))
    assert out_f32.shape == (N, C, H, W), out_f32.shape
    err_f32 = float(jnp.max(jnp.abs(out_f32 - ref)))
    assert jnp.allclose(out_f32, ref, atol=1e-4, rtol=1e-4), err_f32

    # Default bf16-weight / bf16-LHS path (MXU-native): rounding error is a few
    # 1e-3; indexing bugs would produce O(1) errors, so 1e-1 still discriminates.
    out_bf16 = jax.block_until_ready(
        conv_block_forward(x, params, use_oa=use_oa, compute_dtype=jnp.bfloat16))
    err_bf16 = float(jnp.max(jnp.abs(out_bf16 - ref)))
    assert err_bf16 < 1e-1, err_bf16

    print("KERNEL_OK")
</pallas_src>

<mosaic_0001>
module attributes {stable_mosaic.version = 11 : i64} {
  func.func @_conv_block_kernel(%arg0: i32, %arg1: memref<32x128xf32, #tpu.memory_space<vmem>>, %arg2: memref<2x9x128x128xf32, #tpu.memory_space<vmem>>, %arg3: memref<2x1x128xf32, #tpu.memory_space<vmem>>, %arg4: memref<32x128xf32, #tpu.memory_space<vmem>>) attributes {dimension_semantics = [#tpu.dimension_semantics<parallel>], iteration_bounds = array<i64: 1>, scalar_prefetch = 0 : i64, scratch_operands = 0 : i64, tpu.core_type = #tpu.core_type<tc>, window_params = [{transform_indices = @transform_0, window_bounds = array<i64: 32, 128>}, {pipeline_mode = #tpu.pipeline_mode<synchronous>, transform_indices = @transform_1, window_bounds = array<i64: 2, 9, 128, 128>}, {pipeline_mode = #tpu.pipeline_mode<synchronous>, transform_indices = @transform_2, window_bounds = array<i64: 2, 1, 128>}, {transform_indices = @transform_3, window_bounds = array<i64: 32, 128>}]} {
    %c0 = arith.constant 0 : index
    %c0_0 = arith.constant 0 : index
    %0 = vector.load %arg1[%c0, %c0_0] : memref<32x128xf32, #tpu.memory_space<vmem>>, vector<32x128xf32>
    %1 = tpu.iota {dimensions = array<i32: 1>} : vector<32x128xi32>
    %c8_i32 = arith.constant 8 : i32
    %2 = vector.broadcast %c8_i32 : i32 to vector<32x128xi32>
    %3 = arith.cmpi slt, %1, %2 : vector<32x128xi32>
    %c120_i32 = arith.constant 120 : i32
    %4 = vector.broadcast %c120_i32 : i32 to vector<32x128xi32>
    %5 = arith.cmpi sge, %1, %4 : vector<32x128xi32>
    %6 = tpu.iota {dimensions = array<i32: 0>} : vector<32x128xi32>
    %c0_i32 = arith.constant 0 : i32
    %7 = vector.broadcast %c0_i32 : i32 to vector<32x128xi32>
    %8 = arith.cmpi eq, %6, %7 : vector<32x128xi32>
    %c16_i32 = arith.constant 16 : i32
    %9 = vector.broadcast %c16_i32 : i32 to vector<32x128xi32>
    %10 = arith.cmpi eq, %6, %9 : vector<32x128xi32>
    %11 = arith.ori %8, %10 : vector<32x128xi1>
    %c15_i32 = arith.constant 15 : i32
    %12 = vector.broadcast %c15_i32 : i32 to vector<32x128xi32>
    %13 = arith.cmpi eq, %6, %12 : vector<32x128xi32>
    %c31_i32 = arith.constant 31 : i32
    %14 = vector.broadcast %c31_i32 : i32 to vector<32x128xi32>
    %15 = arith.cmpi eq, %6, %14 : vector<32x128xi32>
    %16 = arith.ori %13, %15 : vector<32x128xi1>
    %c1_i32 = arith.constant 1 : i32
    %17 = tpu.dynamic_rotate %0 by %c1_i32 dim 0 : vector<32x128xf32>, i32 -> vector<32x128xf32>
    %c31_i32_1 = arith.constant 31 : i32
    %18 = tpu.dynamic_rotate %0 by %c31_i32_1 dim 0 : vector<32x128xf32>, i32 -> vector<32x128xf32>
    %c17_i32 = arith.constant 17 : i32
    %19 = tpu.dynamic_rotate %0 by %c17_i32 dim 0 : vector<32x128xf32>, i32 -> vector<32x128xf32>
    %20 = arith.select %11, %19, %17 : vector<32x128xi1>, vector<32x128xf32>
    %c15_i32_2 = arith.constant 15 : i32
    %21 = tpu.dynamic_rotate %0 by %c15_i32_2 dim 0 : vector<32x128xf32>, i32 -> vector<32x128xf32>
    %22 = arith.select %16, %21, %18 : vector<32x128xi1>, vector<32x128xf32>
    %c8_i32_3 = arith.constant 8 : i32
    %23 = tpu.dynamic_rotate %20 by %c8_i32_3 dim 1 : vector<32x128xf32>, i32 -> vector<32x128xf32>
    %c120_i32_4 = arith.constant 120 : i32
    %24 = tpu.dynamic_rotate %20 by %c120_i32_4 dim 1 : vector<32x128xf32>, i32 -> vector<32x128xf32>
    %25 = arith.select %3, %24, %23 : vector<32x128xi1>, vector<32x128xf32>
    %26 = arith.select %5, %23, %24 : vector<32x128xi1>, vector<32x128xf32>
    %c0_5 = arith.constant 0 : index
    %c0_6 = arith.constant 0 : index
    %c0_7 = arith.constant 0 : index
    %c0_8 = arith.constant 0 : index
    %27 = vector.load %arg2[%c0_5, %c0_6, %c0_7, %c0_8] : memref<2x9x128x128xf32, #tpu.memory_space<vmem>>, vector<1x1x128x128xf32>
    %28 = vector.shape_cast %27 : vector<1x1x128x128xf32> to vector<128x128xf32>
    %cst = arith.constant dense<0.000000e+00> : vector<32x128xf32>
    %29 = tpu.matmul %25, %28, %cst {dimension_numbers = #tpu.dot_dimension_numbers<[1], [0], [0], [1], [0, 0, 1, 1], [], []>} : vector<32x128xf32>, vector<128x128xf32>, vector<32x128xf32> -> vector<32x128xf32>
    %c0_9 = arith.constant 0 : index
    %c1 = arith.constant 1 : index
    %c0_10 = arith.constant 0 : index
    %c0_11 = arith.constant 0 : index
    %30 = vector.load %arg2[%c0_9, %c1, %c0_10, %c0_11] : memref<2x9x128x128xf32, #tpu.memory_space<vmem>>, vector<1x1x128x128xf32>
    %31 = vector.shape_cast %30 : vector<1x1x128x128xf32> to vector<128x128xf32>
    %cst_12 = arith.constant dense<0.000000e+00> : vector<32x128xf32>
    %32 = tpu.matmul %20, %31, %cst_12 {dimension_numbers = #tpu.dot_dimension_numbers<[1], [0], [0], [1], [0, 0, 1, 1], [], []>} : vector<32x128xf32>, vector<128x128xf32>, vector<32x128xf32> -> vector<32x128xf32>
    %33 = arith.addf %29, %32 : vector<32x128xf32>
    %c0_13 = arith.constant 0 : index
    %c2 = arith.constant 2 : index
    %c0_14 = arith.constant 0 : index
    %c0_15 = arith.constant 0 : index
    %34 = vector.load %arg2[%c0_13, %c2, %c0_14, %c0_15] : memref<2x9x128x128xf32, #tpu.memory_space<vmem>>, vector<1x1x128x128xf32>
    %35 = vector.shape_cast %34 : vector<1x1x128x128xf32> to vector<128x128xf32>
    %cst_16 = arith.constant dense<0.000000e+00> : vector<32x128xf32>
    %36 = tpu.matmul %26, %35, %cst_16 {dimension_numbers = #tpu.dot_dimension_numbers<[1], [0], [0], [1], [0, 0, 1, 1], [], []>} : vector<32x128xf32>, vector<128x128xf32>, vector<32x128xf32> -> vector<32x128xf32>
    %37 = arith.addf %33, %36 : vector<32x128xf32>
    %c8_i32_17 = arith.constant 8 : i32
    %38 = tpu.dynamic_rotate %0 by %c8_i32_17 dim 1 : vector<32x128xf32>, i32 -> vector<32x128xf32>
    %c120_i32_18 = arith.constant 120 : i32
    %39 = tpu.dynamic_rotate %0 by %c120_i32_18 dim 1 : vector<32x128xf32>, i32 -> vector<32x128xf32>
    %40 = arith.select %3, %39, %38 : vector<32x128xi1>, vector<32x128xf32>
    %41 = arith.select %5, %38, %39 : vector<32x128xi1>, vector<32x128xf32>
    %c0_19 = arith.constant 0 : index
    %c3 = arith.constant 3 : index
    %c0_20 = arith.constant 0 : index
    %c0_21 = arith.constant 0 : index
    %42 = vector.load %arg2[%c0_19, %c3, %c0_20, %c0_21] : memref<2x9x128x128xf32, #tpu.memory_space<vmem>>, vector<1x1x128x128xf32>
    %43 = vector.shape_cast %42 : vector<1x1x128x128xf32> to vector<128x128xf32>
    %cst_22 = arith.constant dense<0.000000e+00> : vector<32x128xf32>
    %44 = tpu.matmul %40, %43, %cst_22 {dimension_numbers = #tpu.dot_dimension_numbers<[1], [0], [0], [1], [0, 0, 1, 1], [], []>} : vector<32x128xf32>, vector<128x128xf32>, vector<32x128xf32> -> vector<32x128xf32>
    %45 = arith.addf %37, %44 : vector<32x128xf32>
    %c0_23 = arith.constant 0 : index
    %c4 = arith.constant 4 : index
    %c0_24 = arith.constant 0 : index
    %c0_25 = arith.constant 0 : index
    %46 = vector.load %arg2[%c0_23, %c4, %c0_24, %c0_25] : memref<2x9x128x128xf32, #tpu.memory_space<vmem>>, vector<1x1x128x128xf32>
    %47 = vector.shape_cast %46 : vector<1x1x128x128xf32> to vector<128x128xf32>
    %cst_26 = arith.constant dense<0.000000e+00> : vector<32x128xf32>
    %48 = tpu.matmul %0, %47, %cst_26 {dimension_numbers = #tpu.dot_dimension_numbers<[1], [0], [0], [1], [0, 0, 1, 1], [], []>} : vector<32x128xf32>, vector<128x128xf32>, vector<32x128xf32> -> vector<32x128xf32>
    %49 = arith.addf %45, %48 : vector<32x128xf32>
    %c0_27 = arith.constant 0 : index
    %c5 = arith.constant 5 : index
    %c0_28 = arith.constant 0 : index
    %c0_29 = arith.constant 0 : index
    %50 = vector.load %arg2[%c0_27, %c5, %c0_28, %c0_29] : memref<2x9x128x128xf32, #tpu.memory_space<vmem>>, vector<1x1x128x128xf32>
    %51 = vector.shape_cast %50 : vector<1x1x128x128xf32> to vector<128x128xf32>
    %cst_30 = arith.constant dense<0.000000e+00> : vector<32x128xf32>
    %52 = tpu.matmul %41, %51, %cst_30 {dimension_numbers = #tpu.dot_dimension_numbers<[1], [0], [0], [1], [0, 0, 1, 1], [], []>} : vector<32x128xf32>, vector<128x128xf32>, vector<32x128xf32> -> vector<32x128xf32>
    %53 = arith.addf %49, %52 : vector<32x128xf32>
    %c8_i32_31 = arith.constant 8 : i32
    %54 = tpu.dynamic_rotate %22 by %c8_i32_31 dim 1 : vector<32x128xf32>, i32 -> vector<32x128xf32>
    %c120_i32_32 = arith.constant 120 : i32
    %55 = tpu.dynamic_rotate %22 by %c120_i32_32 dim 1 : vector<32x128xf32>, i32 -> vector<32x128xf32>
    %56 = arith.select %3, %55, %54 : vector<32x128xi1>, vector<32x128xf32>
    %57 = arith.select %5, %54, %55 : vector<32x128xi1>, vector<32x128xf32>
    %c0_33 = arith.constant 0 : index
    %c6 = arith.constant 6 : index
    %c0_34 = arith.constant 0 : index
    %c0_35 = arith.constant 0 : index
    %58 = vector.load %arg2[%c0_33, %c6, %c0_34, %c0_35] : memref<2x9x128x128xf32, #tpu.memory_space<vmem>>, vector<1x1x128x128xf32>
    %59 = vector.shape_cast %58 : vector<1x1x128x128xf32> to vector<128x128xf32>
    %cst_36 = arith.constant dense<0.000000e+00> : vector<32x128xf32>
    %60 = tpu.matmul %56, %59, %cst_36 {dimension_numbers = #tpu.dot_dimension_numbers<[1], [0], [0], [1], [0, 0, 1, 1], [], []>} : vector<32x128xf32>, vector<128x128xf32>, vector<32x128xf32> -> vector<32x128xf32>
    %61 = arith.addf %53, %60 : vector<32x128xf32>
    %c0_37 = arith.constant 0 : index
    %c7 = arith.constant 7 : index
    %c0_38 = arith.constant 0 : index
    %c0_39 = arith.constant 0 : index
    %62 = vector.load %arg2[%c0_37, %c7, %c0_38, %c0_39] : memref<2x9x128x128xf32, #tpu.memory_space<vmem>>, vector<1x1x128x128xf32>
    %63 = vector.shape_cast %62 : vector<1x1x128x128xf32> to vector<128x128xf32>
    %cst_40 = arith.constant dense<0.000000e+00> : vector<32x128xf32>
    %64 = tpu.matmul %22, %63, %cst_40 {dimension_numbers = #tpu.dot_dimension_numbers<[1], [0], [0], [1], [0, 0, 1, 1], [], []>} : vector<32x128xf32>, vector<128x128xf32>, vector<32x128xf32> -> vector<32x128xf32>
    %65 = arith.addf %61, %64 : vector<32x128xf32>
    %c0_41 = arith.constant 0 : index
    %c8 = arith.constant 8 : index
    %c0_42 = arith.constant 0 : index
    %c0_43 = arith.constant 0 : index
    %66 = vector.load %arg2[%c0_41, %c8, %c0_42, %c0_43] : memref<2x9x128x128xf32, #tpu.memory_space<vmem>>, vector<1x1x128x128xf32>
    %67 = vector.shape_cast %66 : vector<1x1x128x128xf32> to vector<128x128xf32>
    %cst_44 = arith.constant dense<0.000000e+00> : vector<32x128xf32>
    %68 = tpu.matmul %57, %67, %cst_44 {dimension_numbers = #tpu.dot_dimension_numbers<[1], [0], [0], [1], [0, 0, 1, 1], [], []>} : vector<32x128xf32>, vector<128x128xf32>, vector<32x128xf32> -> vector<32x128xf32>
    %69 = arith.addf %65, %68 : vector<32x128xf32>
    %c0_45 = arith.constant 0 : index
    %c0_46 = arith.constant 0 : index
    %c0_47 = arith.constant 0 : index
    %70 = vector.load %arg3[%c0_45, %c0_46, %c0_47] : memref<2x1x128xf32, #tpu.memory_space<vmem>>, vector<1x1x128xf32>
    %71 = vector.shape_cast %70 : vector<1x1x128xf32> to vector<1x128xf32>
    %72 = vector.broadcast %71 : vector<1x128xf32> to vector<32x128xf32>
    %73 = arith.addf %69, %72 : vector<32x128xf32>
    %cst_48 = arith.constant 0.00999999977 : f32
    %74 = vector.broadcast %cst_48 : f32 to vector<32x128xf32>
    %75 = arith.mulf %74, %73 : vector<32x128xf32>
    %76 = arith.maximumf %73, %75 : vector<32x128xf32>
    %c1_i32_49 = arith.constant 1 : i32
    %77 = tpu.dynamic_rotate %76 by %c1_i32_49 dim 0 : vector<32x128xf32>, i32 -> vector<32x128xf32>
    %c31_i32_50 = arith.constant 31 : i32
    %78 = tpu.dynamic_rotate %76 by %c31_i32_50 dim 0 : vector<32x128xf32>, i32 -> vector<32x128xf32>
    %c17_i32_51 = arith.constant 17 : i32
    %79 = tpu.dynamic_rotate %76 by %c17_i32_51 dim 0 : vector<32x128xf32>, i32 -> vector<32x128xf32>
    %80 = arith.select %11, %79, %77 : vector<32x128xi1>, vector<32x128xf32>
    %c15_i32_52 = arith.constant 15 : i32
    %81 = tpu.dynamic_rotate %76 by %c15_i32_52 dim 0 : vector<32x128xf32>, i32 -> vector<32x128xf32>
    %82 = arith.select %16, %81, %78 : vector<32x128xi1>, vector<32x128xf32>
    %c8_i32_53 = arith.constant 8 : i32
    %83 = tpu.dynamic_rotate %80 by %c8_i32_53 dim 1 : vector<32x128xf32>, i32 -> vector<32x128xf32>
    %c120_i32_54 = arith.constant 120 : i32
    %84 = tpu.dynamic_rotate %80 by %c120_i32_54 dim 1 : vector<32x128xf32>, i32 -> vector<32x128xf32>
    %85 = arith.select %3, %84, %83 : vector<32x128xi1>, vector<32x128xf32>
    %86 = arith.select %5, %83, %84 : vector<32x128xi1>, vector<32x128xf32>
    %c1_55 = arith.constant 1 : index
    %c0_56 = arith.constant 0 : index
    %c0_57 = arith.constant 0 : index
    %c0_58 = arith.constant 0 : index
    %87 = vector.load %arg2[%c1_55, %c0_56, %c0_57, %c0_58] : memref<2x9x128x128xf32, #tpu.memory_space<vmem>>, vector<1x1x128x128xf32>
    %88 = vector.shape_cast %87 : vector<1x1x128x128xf32> to vector<128x128xf32>
    %cst_59 = arith.constant dense<0.000000e+00> : vector<32x128xf32>
    %89 = tpu.matmul %85, %88, %cst_59 {dimension_numbers = #tpu.dot_dimension_numbers<[1], [0], [0], [1], [0, 0, 1, 1], [], []>} : vector<32x128xf32>, vector<128x128xf32>, vector<32x128xf32> -> vector<32x128xf32>
    %c1_60 = arith.constant 1 : index
    %c1_61 = arith.constant 1 : index
    %c0_62 = arith.constant 0 : index
    %c0_63 = arith.constant 0 : index
    %90 = vector.load %arg2[%c1_60, %c1_61, %c0_62, %c0_63] : memref<2x9x128x128xf32, #tpu.memory_space<vmem>>, vector<1x1x128x128xf32>
    %91 = vector.shape_cast %90 : vector<1x1x128x128xf32> to vector<128x128xf32>
    %cst_64 = arith.constant dense<0.000000e+00> : vector<32x128xf32>
    %92 = tpu.matmul %80, %91, %cst_64 {dimension_numbers = #tpu.dot_dimension_numbers<[1], [0], [0], [1], [0, 0, 1, 1], [], []>} : vector<32x128xf32>, vector<128x128xf32>, vector<32x128xf32> -> vector<32x128xf32>
    %93 = arith.addf %89, %92 : vector<32x128xf32>
    %c1_65 = arith.constant 1 : index
    %c2_66 = arith.constant 2 : index
    %c0_67 = arith.constant 0 : index
    %c0_68 = arith.constant 0 : index
    %94 = vector.load %arg2[%c1_65, %c2_66, %c0_67, %c0_68] : memref<2x9x128x128xf32, #tpu.memory_space<vmem>>, vector<1x1x128x128xf32>
    %95 = vector.shape_cast %94 : vector<1x1x128x128xf32> to vector<128x128xf32>
    %cst_69 = arith.constant dense<0.000000e+00> : vector<32x128xf32>
    %96 = tpu.matmul %86, %95, %cst_69 {dimension_numbers = #tpu.dot_dimension_numbers<[1], [0], [0], [1], [0, 0, 1, 1], [], []>} : vector<32x128xf32>, vector<128x128xf32>, vector<32x128xf32> -> vector<32x128xf32>
    %97 = arith.addf %93, %96 : vector<32x128xf32>
    %c8_i32_70 = arith.constant 8 : i32
    %98 = tpu.dynamic_rotate %76 by %c8_i32_70 dim 1 : vector<32x128xf32>, i32 -> vector<32x128xf32>
    %c120_i32_71 = arith.constant 120 : i32
    %99 = tpu.dynamic_rotate %76 by %c120_i32_71 dim 1 : vector<32x128xf32>, i32 -> vector<32x128xf32>
    %100 = arith.select %3, %99, %98 : vector<32x128xi1>, vector<32x128xf32>
    %101 = arith.select %5, %98, %99 : vector<32x128xi1>, vector<32x128xf32>
    %c1_72 = arith.constant 1 : index
    %c3_73 = arith.constant 3 : index
    %c0_74 = arith.constant 0 : index
    %c0_75 = arith.constant 0 : index
    %102 = vector.load %arg2[%c1_72, %c3_73, %c0_74, %c0_75] : memref<2x9x128x128xf32, #tpu.memory_space<vmem>>, vector<1x1x128x128xf32>
    %103 = vector.shape_cast %102 : vector<1x1x128x128xf32> to vector<128x128xf32>
    %cst_76 = arith.constant dense<0.000000e+00> : vector<32x128xf32>
    %104 = tpu.matmul %100, %103, %cst_76 {dimension_numbers = #tpu.dot_dimension_numbers<[1], [0], [0], [1], [0, 0, 1, 1], [], []>} : vector<32x128xf32>, vector<128x128xf32>, vector<32x128xf32> -> vector<32x128xf32>
    %105 = arith.addf %97, %104 : vector<32x128xf32>
    %c1_77 = arith.constant 1 : index
    %c4_78 = arith.constant 4 : index
    %c0_79 = arith.constant 0 : index
    %c0_80 = arith.constant 0 : index
    %106 = vector.load %arg2[%c1_77, %c4_78, %c0_79, %c0_80] : memref<2x9x128x128xf32, #tpu.memory_space<vmem>>, vector<1x1x128x128xf32>
    %107 = vector.shape_cast %106 : vector<1x1x128x128xf32> to vector<128x128xf32>
    %cst_81 = arith.constant dense<0.000000e+00> : vector<32x128xf32>
    %108 = tpu.matmul %76, %107, %cst_81 {dimension_numbers = #tpu.dot_dimension_numbers<[1], [0], [0], [1], [0, 0, 1, 1], [], []>} : vector<32x128xf32>, vector<128x128xf32>, vector<32x128xf32> -> vector<32x128xf32>
    %109 = arith.addf %105, %108 : vector<32x128xf32>
    %c1_82 = arith.constant 1 : index
    %c5_83 = arith.constant 5 : index
    %c0_84 = arith.constant 0 : index
    %c0_85 = arith.constant 0 : index
    %110 = vector.load %arg2[%c1_82, %c5_83, %c0_84, %c0_85] : memref<2x9x128x128xf32, #tpu.memory_space<vmem>>, vector<1x1x128x128xf32>
    %111 = vector.shape_cast %110 : vector<1x1x128x128xf32> to vector<128x128xf32>
    %cst_86 = arith.constant dense<0.000000e+00> : vector<32x128xf32>
    %112 = tpu.matmul %101, %111, %cst_86 {dimension_numbers = #tpu.dot_dimension_numbers<[1], [0], [0], [1], [0, 0, 1, 1], [], []>} : vector<32x128xf32>, vector<128x128xf32>, vector<32x128xf32> -> vector<32x128xf32>
    %113 = arith.addf %109, %112 : vector<32x128xf32>
    %c8_i32_87 = arith.constant 8 : i32
    %114 = tpu.dynamic_rotate %82 by %c8_i32_87 dim 1 : vector<32x128xf32>, i32 -> vector<32x128xf32>
    %c120_i32_88 = arith.constant 120 : i32
    %115 = tpu.dynamic_rotate %82 by %c120_i32_88 dim 1 : vector<32x128xf32>, i32 -> vector<32x128xf32>
    %116 = arith.select %3, %115, %114 : vector<32x128xi1>, vector<32x128xf32>
    %117 = arith.select %5, %114, %115 : vector<32x128xi1>, vector<32x128xf32>
    %c1_89 = arith.constant 1 : index
    %c6_90 = arith.constant 6 : index
    %c0_91 = arith.constant 0 : index
    %c0_92 = arith.constant 0 : index
    %118 = vector.load %arg2[%c1_89, %c6_90, %c0_91, %c0_92] : memref<2x9x128x128xf32, #tpu.memory_space<vmem>>, vector<1x1x128x128xf32>
    %119 = vector.shape_cast %118 : vector<1x1x128x128xf32> to vector<128x128xf32>
    %cst_93 = arith.constant dense<0.000000e+00> : vector<32x128xf32>
    %120 = tpu.matmul %116, %119, %cst_93 {dimension_numbers = #tpu.dot_dimension_numbers<[1], [0], [0], [1], [0, 0, 1, 1], [], []>} : vector<32x128xf32>, vector<128x128xf32>, vector<32x128xf32> -> vector<32x128xf32>
    %121 = arith.addf %113, %120 : vector<32x128xf32>
    %c1_94 = arith.constant 1 : index
    %c7_95 = arith.constant 7 : index
    %c0_96 = arith.constant 0 : index
    %c0_97 = arith.constant 0 : index
    %122 = vector.load %arg2[%c1_94, %c7_95, %c0_96, %c0_97] : memref<2x9x128x128xf32, #tpu.memory_space<vmem>>, vector<1x1x128x128xf32>
    %123 = vector.shape_cast %122 : vector<1x1x128x128xf32> to vector<128x128xf32>
    %cst_98 = arith.constant dense<0.000000e+00> : vector<32x128xf32>
    %124 = tpu.matmul %82, %123, %cst_98 {dimension_numbers = #tpu.dot_dimension_numbers<[1], [0], [0], [1], [0, 0, 1, 1], [], []>} : vector<32x128xf32>, vector<128x128xf32>, vector<32x128xf32> -> vector<32x128xf32>
    %125 = arith.addf %121, %124 : vector<32x128xf32>
    %c1_99 = arith.constant 1 : index
    %c8_100 = arith.constant 8 : index
    %c0_101 = arith.constant 0 : index
    %c0_102 = arith.constant 0 : index
    %126 = vector.load %arg2[%c1_99, %c8_100, %c0_101, %c0_102] : memref<2x9x128x128xf32, #tpu.memory_space<vmem>>, vector<1x1x128x128xf32>
    %127 = vector.shape_cast %126 : vector<1x1x128x128xf32> to vector<128x128xf32>
    %cst_103 = arith.constant dense<0.000000e+00> : vector<32x128xf32>
    %128 = tpu.matmul %117, %127, %cst_103 {dimension_numbers = #tpu.dot_dimension_numbers<[1], [0], [0], [1], [0, 0, 1, 1], [], []>} : vector<32x128xf32>, vector<128x128xf32>, vector<32x128xf32> -> vector<32x128xf32>
    %129 = arith.addf %125, %128 : vector<32x128xf32>
    %c1_104 = arith.constant 1 : index
    %c0_105 = arith.constant 0 : index
    %c0_106 = arith.constant 0 : index
    %130 = vector.load %arg3[%c1_104, %c0_105, %c0_106] : memref<2x1x128xf32, #tpu.memory_space<vmem>>, vector<1x1x128xf32>
    %131 = vector.shape_cast %130 : vector<1x1x128xf32> to vector<1x128xf32>
    %132 = vector.broadcast %131 : vector<1x128xf32> to vector<32x128xf32>
    %133 = arith.addf %129, %132 : vector<32x128xf32>
    %c0_107 = arith.constant 0 : index
    %c0_108 = arith.constant 0 : index
    %134 = vector.load %arg4[%c0_107, %c0_108] : memref<32x128xf32, #tpu.memory_space<vmem>>, vector<32x128xf32>
    tpu.vector_store %arg4[%c0_107, %c0_108], %133 {strides = array<i32>} : memref<32x128xf32, #tpu.memory_space<vmem>>, vector<32x128xf32>,
    return
  }
  func.func @transform_0(%arg0: i32) -> (i32, i32) {
    %c0_i32 = arith.constant 0 : i32
    %c0_i32_0 = arith.constant 0 : i32
    return %arg0, %c0_i32 : i32, i32
  }
  func.func @transform_1(%arg0: i32) -> (i32, i32, i32, i32) {
    %c0_i32 = arith.constant 0 : i32
    %c0_i32_0 = arith.constant 0 : i32
    %c0_i32_1 = arith.constant 0 : i32
    %c0_i32_2 = arith.constant 0 : i32
    %c0_i32_3 = arith.constant 0 : i32
    return %c0_i32, %c0_i32_0, %c0_i32_1, %c0_i32_2 : i32, i32, i32, i32
  }
  func.func @transform_2(%arg0: i32) -> (i32, i32, i32) {
    %c0_i32 = arith.constant 0 : i32
    %c0_i32_0 = arith.constant 0 : i32
    %c0_i32_1 = arith.constant 0 : i32
    %c0_i32_2 = arith.constant 0 : i32
    return %c0_i32, %c0_i32_0, %c0_i32_1 : i32, i32, i32
  }
  func.func @transform_3(%arg0: i32) -> (i32, i32) {
    %c0_i32 = arith.constant 0 : i32
    %c0_i32_0 = arith.constant 0 : i32
    return %arg0, %c0_i32 : i32, i32
  }
}

</mosaic_0001>

<bundles_post_ra>
// kernel: tpu_custom_call.1
= control target key start
LH: loop header
LB: loop body
LE: loop exit
PB: predicated region body
PF: predicated region fallthrough
CT: control target
= control target key end

     0   :  { %8 = vsyncpa [#allocation3], 0  ;;  %s4828_s0 = inlined_call_operand.hbm [shape: f32[32,128], index: 0, kind: input, shape index: {}]   ;;  %s4829_s1 = inlined_call_operand.hbm [shape: f32[2,9,128,128], index: 1, kind: input, shape index: {}]   ;;  %s4830_s2 = inlined_call_operand.hbm [shape: f32[2,1,128], index: 2, kind: input, shape index: {}]   ;;  %s4831_s3 = inlined_call_operand.hbm [shape: f32[32,128], index: 3, kind: output, shape index: {}]  }
   0x1   :  { %9 = vsyncpa [#allocation6], 0 }
   0x2   :  { %10 = vsyncpa [#allocation4], 0  ;;  %s4140_s12 = smov [#allocation5]   ;;  %s4141_s14 = smov [#allocation2]  }
   0x3   :  { %s28_s13 = sshll.u32 %s4140_s12, 4  ;;  %s16_s15 = sshll.u32 %s4141_s14, 4  ;;  %s29_s13 = int_to_ptr.vmem [resolvable:$true] %s28_s13  ;;  %s4169_s15 = int_to_ptr.vmem [resolvable:$true] %s16_s15 }
   0x4   :  { %s4046_s18 = scalar_lea.hbm %s4829_s1, 36864 }
   0x5   :  { %p4047_p0 = scmp.ne.s32.totalorder %s4829_s1, %s4046_s18  ;;  %p4050_p1 = scmp.lt.u32.totalorder %s4046_s18, %s4829_s1 }
   0x7   :  { %p4052_p2 = pnand %p4050_p1, %p4047_p0 }
   0x9   :  { %4055 = shalt.err (!%p4052_p2)
}
   0xa   :  { %s4056_s23 = scalar_lea.vmem %s29_s13, 36864  ;;  %p4061_p4 = scmp.lt.s32.totalorder %s29_s13, %s29_s13 }
   0xb   :  { %p4057_p3 = scmp.ne.s32.totalorder %s29_s13, %s4056_s23  ;;  %p4062_p5 = scmp.lt.s32.totalorder %s4056_s23, %s4056_s23 }
   0xd   :  { %p4063_p6 = por %p4062_p5, %p4061_p4 }
   0xf   :  { %p4064_p7 = pnand %p4063_p6, %p4057_p3 }
  0x11   :  { %4067 = shalt.err (!%p4064_p7)
}
  0x12   :  { %s4142_s24 = smov 128   ;;  %s4143_s25 = smov 8  }
  0x13   :  { %34 = dma.hbm_to_vmem [thread:$0]  %s4829_s1, 36864, %s29_s13, [#allocation6], %s4142_s24, %s4142_s24, %s4143_s25  }
  0x14   :  { %s4068_s30 = scalar_lea.hbm %s4828_s0, 512 }
  0x15   :  { %p4069_p8 = scmp.ne.s32.totalorder %s4828_s0, %s4068_s30  ;;  %p4072_p9 = scmp.lt.u32.totalorder %s4068_s30, %s4828_s0 }
  0x17   :  { %p4074_p10 = pnand %p4072_p9, %p4069_p8 }
  0x19   :  { %4077 = shalt.err (!%p4074_p10)
}
  0x1a   :  { %s4078_s8 = scalar_lea.vmem %s4169_s15, 512  ;;  %p4083_p12 = scmp.lt.s32.totalorder %s4169_s15, %s4169_s15 }
  0x1b   :  { %p4079_p11 = scmp.ne.s32.totalorder %s4169_s15, %s4078_s8  ;;  %p4084_p13 = scmp.lt.s32.totalorder %s4078_s8, %s4078_s8 }
  0x1d   :  { %p4085_p0 = por %p4084_p13, %p4083_p12 }
  0x1f   :  { %p4086_p1 = pnand %p4085_p0, %p4079_p11 }
  0x21   :  { %4089 = shalt.err (!%p4086_p1)
}
  0x22   :  { %22 = dma.hbm_to_vmem [thread:$0]  %s4828_s0, 512, %s4169_s15, [#allocation3], %s4142_s24, %s4142_s24, %s4143_s25  }
  0x23   :  { %s4144_s10 = smov [#allocation7]   ;;  %s4090_s14 = scalar_lea.hbm %s4830_s2, 32 }
  0x24   :  { %s40_s11 = sshll.u32 %s4144_s10, 4  ;;  %p4091_p2 = scmp.ne.s32.totalorder %s4830_s2, %s4090_s14  ;;  %s41_s11 = int_to_ptr.vmem [resolvable:$true] %s40_s11 }
  0x25   :  { %p4094_p3 = scmp.lt.u32.totalorder %s4090_s14, %s4830_s2 }
  0x27   :  { %p4096_p4 = pnand %p4094_p3, %p4091_p2 }
  0x29   :  { %4099 = shalt.err (!%p4096_p4)
}
  0x2a   :  { %s4100_s20 = scalar_lea.vmem %s41_s11, 32  ;;  %p4105_p6 = scmp.lt.s32.totalorder %s41_s11, %s41_s11 }
  0x2b   :  { %p4101_p5 = scmp.ne.s32.totalorder %s41_s11, %s4100_s20  ;;  %p4106_p7 = scmp.lt.s32.totalorder %s4100_s20, %s4100_s20 }
  0x2d   :  { %p4107_p8 = por %p4106_p7, %p4105_p6 }
  0x2f   :  { %p4108_p9 = pnand %p4107_p8, %p4101_p5 }
  0x31   :  { %4111 = shalt.err (!%p4108_p9)
}
  0x32   :  { %s4145_s0 = smov 16   ;;  %s4146_s15 = smov 1  }
  0x33   :  { %46 = dma.hbm_to_vmem [thread:$0]  %s4830_s2, 32, %s41_s11, [#allocation6], %s4145_s0, %s4145_s0, %s4146_s15  }
  0x34   :  { %4134 = dma.done.wait [#allocation3], 512  }
  0x35   :  { %4135 = vsyncadd [#allocation3], 4294966784 }
  0x36   :  { %4136 = dma.done.wait [#allocation6], 36896  }
  0x37   :  { %4137 = vsyncadd [#allocation6], 4294930400  ;;  %v60_v0 = vlaneseq  ;;  %v4224_v3 = vld [vmem:[#allocation2] sm:$0xff]  ;;  %v4226_v4 = vld [vmem:[#allocation2 + $0x8] sm:$0xff]  ;;  %s4147_s2 = smov 120   ;;  %s4148_s23 = smov [#allocation8]  }
  0x38   :  { %v4228_v5 = vld [vmem:[#allocation2 + $0x10] sm:$0xff]  ;;  %v4231_v6 = vld [vmem:[#allocation2 + $0x18] sm:$0xff]  ;;  %v93_v7 = vrot.slane %v4224_v3, 7  ;;  %v94_v8 = vrot.slane %v4226_v4, 7  ;;  %v160_v10 = vld [vmem:[#allocation5 + $0x80] sm:$0xff]  ;;  %v3951_v33 = vpack.i.bf16 %v4226_v4, %v4224_v3  ;;  %v102_v55 = vrot.slane %v4224_v3, 1 }
  0x39   :  { %v4219_v1 = vshrl.u32 %v60_v0, 7  ;;  %v95_v9 = vrot.slane %v4228_v5, 7  ;;  %v161_v11 = vld [vmem:[#allocation5 + $0x88] sm:$0xff]  ;;  %v96_v12 = vrot.slane %v4231_v6, 7  ;;  %v162_v14 = vld [vmem:[#allocation5 + $0x90] sm:$0xff]  ;;  %v163_v15 = vld [vmem:[#allocation5 + $0x98] sm:$0xff]  ;;  %v3961_v37 = vpack.i.bf16 %v4231_v6, %v4228_v5 }
  0x3a   :  { %v3277_v13 = vpack.c.bf16 %v161_v11, %v160_v10  ;;  %v3281_v18 = vpack.c.bf16 %v163_v15, %v162_v14  ;;  %v164_v19 = vld [vmem:[#allocation5 + $0xa0] sm:$0xff]  ;;  %v165_v20 = vld [vmem:[#allocation5 + $0xa8] sm:$0xff]  ;;  %v166_v28 = vld [vmem:[#allocation5 + $0xb0] sm:$0xff]  ;;  %v103_v56 = vrot.slane %v4226_v4, 1  ;;  %v104_v57 = vrot.slane %v4228_v5, 1  ;;  %s2218_s26 = sshll.u32 %s4148_s23, 4  ;;  %s2219_s26 = int_to_ptr.vmem [resolvable:$true] %s2218_s26 }
  0x3b   :  { %v4222_v2 = vadd.s32 16, %v4219_v1  ;;  %vm97_vm0 = vcmp.lt.s32.totalorder %v4219_v1, 1  ;;  %vm69_vm1 = vcmp.eq.s32.totalorder %v4219_v1, 0  ;;  %v3285_v27 = vpack.c.bf16 %v165_v20, %v164_v19  ;;  %v167_v29 = vld [vmem:[#allocation5 + $0xb8] sm:$0xff]  ;;  %v168_v31 = vld [vmem:[#allocation5 + $0xc0] sm:$0xff]  ;;  %v169_v32 = vld [vmem:[#allocation5 + $0xc8] sm:$0xff]  ;;  %p4117_p11 = scmp.lt.s32.totalorder %s2219_s26, %s2219_s26 }
  0x3c   :  { %v99_v16 = vsel %vm97_vm0, %v94_v8, %v95_v9  ;;  %v100_v17 = vsel %vm97_vm0, %v93_v7, %v94_v8  ;;  %v101_v21 = vsel %vm97_vm0, %v96_v12, %v93_v7  ;;  %v4247_v22 = vsel %vm97_vm0, %v95_v9, %v96_v12  ;;  %3278 = vmatprep.subr.bf16.mxu0 %v3277_v13  ;;  %v170_v35 = vld [vmem:[#allocation5 + $0xd0] sm:$0xff]  ;;  %v171_v36 = vld [vmem:[#allocation5 + $0xd8] sm:$0xff]  ;;  %v172_v39 = vld [vmem:[#allocation5 + $0xe0] sm:$0xff]  ;;  %s4112_s27 = scalar_lea.vmem %s2219_s26, 512 }
  0x3d   :  { %vm75_vm2 = vcmp.eq.s32.totalorder %v4222_v2, 16  ;;  %v111_v23 = vsel %vm69_vm1, %v99_v16, %v101_v21  ;;  %3280 = vmatpush3.bf16.msra.mxu0 %v3277_v13  ;;  %v3289_v30 = vpack.c.bf16 %v167_v29, %v166_v28  ;;  %v3293_v34 = vpack.c.bf16 %v169_v32, %v168_v31  ;;  %v173_v40 = vld [vmem:[#allocation5 + $0xe8] sm:$0xff]  ;;  %v174_v42 = vld [vmem:[#allocation5 + $0xf0] sm:$0xff]  ;;  %v175_v43 = vld [vmem:[#allocation5 + $0xf8] sm:$0xff]  ;;  %p4113_p10 = scmp.ne.s32.totalorder %s2219_s26, %s4112_s27  ;;  %p4118_p12 = scmp.lt.s32.totalorder %s4112_s27, %s4112_s27 }
  0x3e   :  { %v113_v24 = vsel %vm75_vm2, %v101_v21, %v99_v16  ;;  %v3926_v25 = vpack.i.bf16 %v100_v17, %v111_v23  ;;  %3282 = vmatprep.subr.bf16.mxu0 %v3281_v18  ;;  %2625 = vmatprep.mubr.f32.mxu0 %v111_v23  ;;  %v3297_v38 = vpack.c.bf16 %v171_v36, %v170_v35  ;;  %v143_v45 = vld [vmem:[#allocation5] sm:$0xff]  ;;  %v144_v46 = vld [vmem:[#allocation5 + $0x8] sm:$0xff]  ;;  %v145_v48 = vld [vmem:[#allocation5 + $0x10] sm:$0xff]  ;;  %v4267_v54 = vadd.s32 8, %v4219_v1 }
  0x3f   :  { %v3936_v26 = vpack.i.bf16 %v4247_v22, %v113_v24  ;;  %v3301_v41 = vpack.c.bf16 %v173_v40, %v172_v39  ;;  %v3305_v44 = vpack.c.bf16 %v175_v43, %v174_v42  ;;  %v3309_v47 = vpack.c.bf16 %v144_v46, %v143_v45  ;;  %v146_v49 = vld [vmem:[#allocation5 + $0x18] sm:$0xff]  ;;  %v147_v51 = vld [vmem:[#allocation5 + $0x20] sm:$0xff]  ;;  %v148_v52 = vld [vmem:[#allocation5 + $0x28] sm:$0xff]  ;;  %p4119_p13 = por %p4118_p12, %p4117_p11 }
  0x40   :  { %3927 = vrot.lane.b32.xlu0 %v3926_v25, %s4143_s25  ;;  %v3313_v50 = vpack.c.bf16 %v146_v49, %v145_v48  ;;  %v3317_v53 = vpack.c.bf16 %v148_v52, %v147_v51  ;;  %v149_v58 = vld [vmem:[#allocation5 + $0x30] sm:$0xff]  ;;  %v150_v59 = vld [vmem:[#allocation5 + $0x38] sm:$0xff]  ;;  %v105_v60 = vrot.slane %v4231_v6, 1  ;;  %vm106_vm3 = vcmp.lt.s32.totalorder %v4219_v1, 7  ;;  %v151_v9 = vld [vmem:[#allocation5 + $0x40] sm:$0xff] }
  0x41   :  { %3937 = vrot.lane.b32.xlu1 %v3936_v26, %s4143_s25  ;;  %3284 = vmatpush3.bf16.msra.mxu0 %v3281_v18  ;;  %vm82_vm4 = vcmp.eq.s32.totalorder %v4267_v54, 15  ;;  %v108_v61 = vsel %vm106_vm3, %v103_v56, %v104_v57  ;;  %v4280_v62 = vsel %vm106_vm3, %v102_v55, %v103_v56  ;;  %v3321_v7 = vpack.c.bf16 %v150_v59, %v149_v58  ;;  %v152_v10 = vld [vmem:[#allocation5 + $0x48] sm:$0xff]  ;;  %v153_v13 = vld [vmem:[#allocation5 + $0x50] sm:$0xff]  ;;  %v154_v14 = vld [vmem:[#allocation5 + $0x58] sm:$0xff]  ;;  %p4120_p0 = pnand %p4119_p13, %p4113_p10 }
  0x42   :  { %3286 = vmatprep.subr.bf16.mxu0 %v3285_v27  ;;  %v110_v63 = vsel %vm106_vm3, %v105_v60, %v102_v55  ;;  %v3325_v12 = vpack.c.bf16 %v152_v10, %v151_v9  ;;  %v3329_v15 = vpack.c.bf16 %v154_v14, %v153_v13  ;;  %v155_v16 = vld [vmem:[#allocation5 + $0x60] sm:$0xff]  ;;  %v157_v19 = vld [vmem:[#allocation5 + $0x70] sm:$0xff]  ;;  %v158_v20 = vld [vmem:[#allocation5 + $0x78] sm:$0xff]  ;;  %v4309_v29 = vand.u32 127, %v60_v0 }
  0x43   :  { %v4286_v8 = vsel %vm82_vm4, %v110_v63, %v108_v61  ;;  %v3337_v21 = vpack.c.bf16 %v158_v20, %v157_v19  ;;  %v348_v23 = vld [vmem:[#allocation5 + $0x108] sm:$0xff]  ;;  %v349_v36 = vld [vmem:[#allocation5 + $0x110] sm:$0xff] }
  0x44   :  { %3932 = vrot.lane.b32.xlu0 %v3926_v25, %s4147_s2  ;;  %v3971_v11 = vpack.i.bf16 %v4286_v8, %v4280_v62  ;;  %v4293_v25 = vadd.s32 24, %v4219_v1  ;;  %vm62_vm6 = vcmp.lt.s32.totalorder %v4309_v29, 8  ;;  %vm63_vm7 = vcmp.ge.s32.totalorder %v4309_v29, 120  ;;  %v352_v48 = vld [vmem:[#allocation5 + $0x128] sm:$0xff]  ;;  %v357_v20 = vld [vmem:[#allocation5 + $0x150] sm:$0xff]  ;;  %v1219_v1 = vld [vmem:[#allocation5 + $0x4f8] sm:$0xff] }
  0x45   :  { %3942 = vrot.lane.b32.xlu1 %v3936_v26, %s4147_s2  ;;  %3288 = vmatpush3.bf16.msra.mxu0 %v3285_v27  ;;  %v4298_v26 = vsel %vm106_vm3, %v104_v57, %v105_v60  ;;  %v1998_v29 = vld [vmem:[#allocation5 + $0x860] sm:$0xff] }
  0x46   :  { %3290 = vmatprep.subr.bf16.mxu0 %v3289_v30  ;;  %vm88_vm5 = vcmp.eq.s32.totalorder %v4293_v25, 31 }
  0x47   :  { %v4302_v27 = vsel %vm88_vm5, %v108_v61, %v110_v63  ;;  %v353_v61 = vld [vmem:[#allocation5 + $0x130] sm:$0xff]  ;;  %v354_v63 = vld [vmem:[#allocation5 + $0x138] sm:$0xff] }
  0x48   :  { %3947 = vrot.lane.b32.xlu0 %v3951_v33, %s4143_s25  ;;  %v3981_v28 = vpack.i.bf16 %v4302_v27, %v4298_v26  ;;  %v3353_v14 = vpack.c.bf16 %v354_v63, %v353_v61 }
  0x49   :  { %3952 = vrot.lane.b32.xlu1 %v3951_v33, %s4147_s2  ;;  %3292 = vmatpush3.bf16.msra.mxu0 %v3289_v30 }
  0x4a   :  { %3294 = vmatprep.subr.bf16.mxu0 %v3293_v34 }
  0x4c   :  { %3957 = vrot.lane.b32.xlu0 %v3961_v37, %s4143_s25 }
  0x4d   :  { %3962 = vrot.lane.b32.xlu1 %v3961_v37, %s4147_s2  ;;  %3296 = vmatpush3.bf16.msra.mxu0 %v3293_v34  ;;  %v350_v37 = vld [vmem:[#allocation5 + $0x118] sm:$0xff] }
  0x4e   :  { %3298 = vmatprep.subr.bf16.mxu0 %v3297_v38  ;;  %v3345_v46 = vpack.c.bf16 %v350_v37, %v349_v36  ;;  %v361_v36 = vld [vmem:[#allocation5 + $0x170] sm:$0xff]  ;;  %v362_v37 = vld [vmem:[#allocation5 + $0x178] sm:$0xff] }
  0x50   :  { %3967 = vrot.lane.b32.xlu0 %v3971_v11, %s4143_s25 }
  0x51   :  { %3300 = vmatpush3.bf16.msra.mxu0 %v3297_v38  ;;  %3972 = vrot.lane.b32.xlu1 %v3971_v11, %s4147_s2 }
  0x52   :  { %3302 = vmatprep.subr.bf16.mxu0 %v3301_v41 }
  0x54   :  { %3977 = vrot.lane.b32.xlu0 %v3981_v28, %s4143_s25 }
  0x55   :  { %3304 = vmatpush3.bf16.msra.mxu0 %v3301_v41  ;;  %3982 = vrot.lane.b32.xlu1 %v3981_v28, %s4147_s2 }
  0x56   :  { %3306 = vmatprep.subr.bf16.mxu0 %v3305_v44 }
  0x59   :  { %3308 = vmatpush3.bf16.msra.mxu0 %v3305_v44 }
  0x5a   :  { %3310 = vmatprep.subr.bf16.mxu0 %v3309_v47 }
  0x5c   :  { %2626 = vmatmul.mubr.f32.vlgmr.msra.gmra.mrb[0].mxu0 %v100_v17  ;;  %v156_v17 = vld [vmem:[#allocation5 + $0x68] sm:$0xff] }
  0x5d   :  { %3312 = vmatpush3.bf16.msra.mxu0 %v3309_v47  ;;  %2628 = vmatprep.mubr.f32.mxu0 %v113_v24  ;;  %v3333_v18 = vpack.c.bf16 %v156_v17, %v155_v16  ;;  %v351_v47 = vld [vmem:[#allocation5 + $0x120] sm:$0xff] }
  0x5e   :  { %3314 = vmatprep.subr.bf16.mxu0 %v3313_v50  ;;  %v3349_v57 = vpack.c.bf16 %v352_v48, %v351_v47  ;;  %v355_v17 = vld [vmem:[#allocation5 + $0x140] sm:$0xff] }
  0x60   :  { %2629 = vmatmul.mubr.f32.gmra.mrb[2].mxu0 %v4247_v22  ;;  %v347_v22 = vld [vmem:[#allocation5 + $0x100] sm:$0xff] }
  0x61   :  { %3316 = vmatpush3.bf16.msra.mxu0 %v3313_v50  ;;  %v3341_v24 = vpack.c.bf16 %v348_v23, %v347_v22  ;;  %v359_v23 = vld [vmem:[#allocation5 + $0x160] sm:$0xff] }
  0x62   :  { %3318 = vmatprep.subr.bf16.mxu0 %v3317_v53 }
  0x65   :  { %3320 = vmatpush3.bf16.msra.mxu0 %v3317_v53 }
  0x66   :  { %3322 = vmatprep.subr.bf16.mxu0 %v3321_v7 }
  0x69   :  { %3324 = vmatpush3.bf16.msra.mxu0 %v3321_v7 }
  0x6a   :  { %3326 = vmatprep.subr.bf16.mxu0 %v3325_v12 }
  0x6d   :  { %3328 = vmatpush3.bf16.msra.mxu0 %v3325_v12 }
  0x6e   :  { %3330 = vmatprep.subr.bf16.mxu0 %v3329_v15 }
  0x71   :  { %3332 = vmatpush3.bf16.msra.mxu0 %v3329_v15 }
  0x72   :  { %3334 = vmatprep.subr.bf16.mxu0 %v3333_v18 }
  0x75   :  { %3336 = vmatpush3.bf16.msra.mxu0 %v3333_v18  ;;  %v356_v18 = vld [vmem:[#allocation5 + $0x148] sm:$0xff] }
  0x76   :  { %3338 = vmatprep.subr.bf16.mxu0 %v3337_v21  ;;  %v3357_v19 = vpack.c.bf16 %v356_v18, %v355_v17  ;;  %v481_v17 = vld [vmem:[#allocation5 + $0x1a0] sm:$0xff]  ;;  %v482_v18 = vld [vmem:[#allocation5 + $0x1a8] sm:$0xff] }
  0x79   :  { %3340 = vmatpush3.bf16.msra.mxu0 %v3337_v21  ;;  %v358_v21 = vld [vmem:[#allocation5 + $0x158] sm:$0xff] }
  0x7a   :  { %3342 = vmatprep.subr.bf16.mxu0 %v3341_v24  ;;  %v3361_v22 = vpack.c.bf16 %v358_v21, %v357_v20  ;;  %v484_v20 = vld [vmem:[#allocation5 + $0x1b8] sm:$0xff] }
  0xb2   :  { %v4311_v30 = vpop.permute.xlu0 %3927 }
  0xb3   :  { %v4313_v31 = vpop.permute.xlu1 %3937  ;;  %v3930_v33 = vunpack.i.h.bf16 %v4311_v30  ;;  %v3929_v38 = vunpack.i.l.bf16 %v4311_v30 }
  0xb4   :  { %v3939_v32 = vunpack.i.l.bf16 %v4313_v31  ;;  %v3940_v41 = vunpack.i.h.bf16 %v4313_v31 }
  0xb6   :  { %v4318_v34 = vpop.permute.xlu0 %3932 }
  0xb7   :  { %v4320_v35 = vpop.permute.xlu1 %3942  ;;  %v3935_v0 = vunpack.i.h.bf16 %v4318_v34  ;;  %v3934_v39 = vunpack.i.l.bf16 %v4318_v34 }
  0xb8   :  { %v3944_v40 = vunpack.i.l.bf16 %v4320_v35  ;;  %v3945_v42 = vunpack.i.h.bf16 %v4320_v35  ;;  %v489_v35 = vld [vmem:[#allocation5 + $0x1e0] sm:$0xff] }
  0xb9   :  { %v135_v43 = vsel %vm62_vm6, %v3934_v39, %v3929_v38  ;;  %v136_v44 = vsel %vm62_vm6, %v3935_v0, %v3930_v33  ;;  %v139_v60 = vsel %vm63_vm7, %v3929_v38, %v3934_v39  ;;  %v3369_v38 = vpack.c.bf16 %v362_v37, %v361_v36  ;;  %v477_v39 = vld [vmem:[#allocation5 + $0x180] sm:$0xff]  ;;  %v492_v36 = vld [vmem:[#allocation5 + $0x1f8] sm:$0xff] }
  0xba   :  { %v137_v45 = vsel %vm62_vm6, %v3944_v40, %v3939_v32  ;;  %2663 = vmatprep.mubr.f32.mxu0 %v135_v43  ;;  %v4345_v50 = vpop.permute.xlu0 %3947  ;;  %v138_v56 = vsel %vm62_vm6, %v3945_v42, %v3940_v41  ;;  %v478_v43 = vld [vmem:[#allocation5 + $0x188] sm:$0xff] }
  0xbb   :  { %v4343_v49 = vpop.permute.xlu1 %3952  ;;  %2664 = vmatmul.mubr.f32.vlgmr.msra.gmra.mrb[0].mxu0 %v136_v44  ;;  %v3950_v53 = vunpack.i.h.bf16 %v4345_v50  ;;  %v3949_v55 = vunpack.i.l.bf16 %v4345_v50  ;;  %v3373_v44 = vpack.c.bf16 %v478_v43, %v477_v39  ;;  %v584_v39 = vld [vmem:[#allocation5 + $0x208] sm:$0xff] }
  0xbc   :  { %v3955_v51 = vunpack.i.h.bf16 %v4343_v49  ;;  %v3954_v52 = vunpack.i.l.bf16 %v4343_v49  ;;  %3344 = vmatpush3.bf16.msra.mxu0 %v3341_v24  ;;  %2666 = vmatprep.mubr.f32.mxu0 %v137_v45  ;;  %v360_v24 = vld [vmem:[#allocation5 + $0x168] sm:$0xff]  ;;  %v479_v45 = vld [vmem:[#allocation5 + $0x190] sm:$0xff] }
  0xbd   :  { %3346 = vmatprep.subr.bf16.mxu0 %v3345_v46  ;;  %v3365_v28 = vpack.c.bf16 %v360_v24, %v359_v23  ;;  %v486_v23 = vld [vmem:[#allocation5 + $0x1c8] sm:$0xff] }
  0xbe   :  { %v4363_v58 = vsel %vm63_vm7, %v3949_v55, %v3954_v52  ;;  %v4371_v59 = vsel %vm63_vm7, %v3950_v53, %v3955_v51  ;;  %v4377_v9 = vpop.permute.xlu0 %3957  ;;  %v468_v34 = vsel %vm62_vm6, %v3954_v52, %v3949_v55  ;;  %v487_v52 = vld [vmem:[#allocation5 + $0x1d0] sm:$0xff]  ;;  %v488_v55 = vld [vmem:[#allocation5 + $0x1d8] sm:$0xff] }
  0xbf   :  { %v4375_v7 = vpop.permute.xlu1 %3962  ;;  %2667 = vmatmul.mubr.f32.gmra.mrb[2].mxu0 %v138_v56  ;;  %v3960_v12 = vunpack.i.h.bf16 %v4377_v9  ;;  %v3959_v13 = vunpack.i.l.bf16 %v4377_v9  ;;  %v3393_v31 = vpack.c.bf16 %v488_v55, %v487_v52  ;;  %v596_v52 = vld [vmem:[#allocation5 + $0x268] sm:$0xff] }
  0xc0   :  { %v3965_v10 = vunpack.i.h.bf16 %v4375_v7  ;;  %v3964_v11 = vunpack.i.l.bf16 %v4375_v7  ;;  %3348 = vmatpush3.bf16.msra.mxu0 %v3345_v46  ;;  %2701 = vmatprep.mubr.f32.mxu0 %v139_v60  ;;  %v480_v46 = vld [vmem:[#allocation5 + $0x198] sm:$0xff] }
  0xc1   :  { %3350 = vmatprep.subr.bf16.mxu0 %v3349_v57  ;;  %v3377_v60 = vpack.c.bf16 %v480_v46, %v479_v45  ;;  %v594_v7 = vld [vmem:[#allocation5 + $0x258] sm:$0xff] }
  0xc2   :  { %v4389_v15 = vsel %vm63_vm7, %v3959_v13, %v3964_v11  ;;  %v4397_v16 = vsel %vm63_vm7, %v3960_v12, %v3965_v10  ;;  %v471_v49 = vsel %vm62_vm6, %v3965_v10, %v3960_v12  ;;  %v595_v12 = vld [vmem:[#allocation5 + $0x260] sm:$0xff] }
  0xc3   :  { %v4399_v47 = vpop.permute.xlu1 %3972  ;;  %v3429_v55 = vpack.c.bf16 %v596_v52, %v595_v12  ;;  %v701_v12 = vld [vmem:[#allocation5 + $0x2e0] sm:$0xff]  ;;  %v702_v52 = vld [vmem:[#allocation5 + $0x2e8] sm:$0xff] }
  0xc4   :  { %3352 = vmatpush3.bf16.msra.mxu0 %v3349_v57  ;;  %v3975_v48 = vunpack.i.h.bf16 %v4399_v47  ;;  %v3974_v56 = vunpack.i.l.bf16 %v4399_v47  ;;  %v4403_v57 = vpop.permute.xlu0 %3967 }
  0xc5   :  { %3354 = vmatprep.subr.bf16.mxu0 %v3353_v14  ;;  %v3970_v61 = vunpack.i.h.bf16 %v4403_v57  ;;  %v3969_v63 = vunpack.i.l.bf16 %v4403_v57  ;;  %v931_v57 = vld [vmem:[#allocation5 + $0x3b0] sm:$0xff] }
  0xc7   :  { %v4425_v30 = vsel %vm63_vm7, %v3969_v63, %v3974_v56  ;;  %v4447_v43 = vpop.permute.xlu1 %3982 }
  0xc8   :  { %3356 = vmatpush3.bf16.msra.mxu0 %v3353_v14  ;;  %v140_v14 = vsel %vm63_vm7, %v3930_v33, %v3935_v0  ;;  %v4433_v33 = vsel %vm63_vm7, %v3970_v61, %v3975_v48  ;;  %v142_v0 = vsel %vm63_vm7, %v3940_v41, %v3945_v42  ;;  %v491_v42 = vld [vmem:[#allocation5 + $0x1f0] sm:$0xff]  ;;  %v3985_v45 = vunpack.i.h.bf16 %v4447_v43 }
  0xc9   :  { %3358 = vmatprep.subr.bf16.mxu0 %v3357_v19  ;;  %v3401_v37 = vpack.c.bf16 %v492_v36, %v491_v42  ;;  %v3984_v46 = vunpack.i.l.bf16 %v4447_v43  ;;  %v691_v36 = vld [vmem:[#allocation5 + $0x290] sm:$0xff]  ;;  %v936_v43 = vld [vmem:[#allocation5 + $0x3d8] sm:$0xff] }
  0xcc   :  { %3360 = vmatpush3.bf16.msra.mxu0 %v3357_v19  ;;  %v141_v19 = vsel %vm63_vm7, %v3939_v32, %v3944_v40  ;;  %v3381_v32 = vpack.c.bf16 %v482_v18, %v481_v17  ;;  %v483_v40 = vld [vmem:[#allocation5 + $0x1b0] sm:$0xff] }
  0xcd   :  { %3362 = vmatprep.subr.bf16.mxu0 %v3361_v22  ;;  %v3385_v21 = vpack.c.bf16 %v484_v20, %v483_v40  ;;  %v585_v18 = vld [vmem:[#allocation5 + $0x210] sm:$0xff]  ;;  %v470_v20 = vsel %vm62_vm6, %v3964_v11, %v3959_v13  ;;  %v591_v13 = vld [vmem:[#allocation5 + $0x240] sm:$0xff] }
  0xd0   :  { %3364 = vmatpush3.bf16.msra.mxu0 %v3361_v22  ;;  %v485_v22 = vld [vmem:[#allocation5 + $0x1c0] sm:$0xff] }
  0xd1   :  { %3366 = vmatprep.subr.bf16.mxu0 %v3365_v28  ;;  %v3389_v24 = vpack.c.bf16 %v486_v23, %v485_v22  ;;  %v588_v22 = vld [vmem:[#allocation5 + $0x228] sm:$0xff] }
  0xd2   :  { %v592_v23 = vld [vmem:[#allocation5 + $0x248] sm:$0xff] }
  0xd3   :  { %v3421_v9 = vpack.c.bf16 %v592_v23, %v591_v13  ;;  %v1227_v23 = vld [vmem:[#allocation5 + $0x530] sm:$0xff] }
  0xd4   :  { %3368 = vmatpush3.bf16.msra.mxu0 %v3365_v28  ;;  %v490_v28 = vld [vmem:[#allocation5 + $0x1e8] sm:$0xff] }
  0xd5   :  { %3370 = vmatprep.subr.bf16.mxu0 %v3369_v38  ;;  %v3397_v41 = vpack.c.bf16 %v490_v28, %v489_v35  ;;  %v598_v35 = vld [vmem:[#allocation5 + $0x278] sm:$0xff]  ;;  %v689_v28 = vld [vmem:[#allocation5 + $0x280] sm:$0xff] }
  0xd8   :  { %3372 = vmatpush3.bf16.msra.mxu0 %v3369_v38  ;;  %v583_v38 = vld [vmem:[#allocation5 + $0x200] sm:$0xff] }
  0xd9   :  { %3374 = vmatprep.subr.bf16.mxu0 %v3373_v44  ;;  %v3405_v17 = vpack.c.bf16 %v584_v39, %v583_v38  ;;  %v693_v39 = vld [vmem:[#allocation5 + $0x2a0] sm:$0xff] }
  0xdb   :  { %2702 = vmatmul.mubr.f32.vlgmr.msra.gmra.mrb[0].mxu0 %v140_v14 }
  0xdc   :  { %2704 = vmatprep.mubr.f32.mxu0 %v141_v19  ;;  %3376 = vmatpush3.bf16.msra.mxu0 %v3373_v44  ;;  %v4449_v44 = vpop.permute.xlu0 %3977  ;;  %v586_v19 = vld [vmem:[#allocation5 + $0x218] sm:$0xff] }
  0xdd   :  { %3378 = vmatprep.subr.bf16.mxu0 %v3377_v60  ;;  %v3979_v14 = vunpack.i.l.bf16 %v4449_v44  ;;  %v3409_v40 = vpack.c.bf16 %v586_v19, %v585_v18  ;;  %v695_v19 = vld [vmem:[#allocation5 + $0x2b0] sm:$0xff] }
  0xdf   :  { %2705 = vmatmul.mubr.f32.gmra.mrb[2].mxu0 %v142_v0  ;;  %v469_v0 = vsel %vm62_vm6, %v3955_v51, %v3950_v53  ;;  %v589_v51 = vld [vmem:[#allocation5 + $0x230] sm:$0xff]  ;;  %v590_v53 = vld [vmem:[#allocation5 + $0x238] sm:$0xff] }
  0xe0   :  { %3380 = vmatpush3.bf16.msra.mxu0 %v3377_v60  ;;  %2739 = vmatprep.mubr.f32.mxu0 %v468_v34  ;;  %v3980_v60 = vunpack.i.h.bf16 %v4449_v44  ;;  %v3417_v11 = vpack.c.bf16 %v590_v53, %v589_v51  ;;  %v1225_v51 = vld [vmem:[#allocation5 + $0x520] sm:$0xff]  ;;  %v1226_v53 = vld [vmem:[#allocation5 + $0x528] sm:$0xff] }
  0xe1   :  { %3382 = vmatprep.subr.bf16.mxu0 %v3381_v32 }
  0xe2   :  { %v4469_v34 = vsel %vm63_vm7, %v3980_v60, %v3985_v45  ;;  %v813_v47 = vsel %vm62_vm6, %v3985_v45, %v3980_v60  ;;  %v937_v60 = vld [vmem:[#allocation5 + $0x3e0] sm:$0xff] }
  0xe4   :  { %3384 = vmatpush3.bf16.msra.mxu0 %v3381_v32  ;;  %v4461_v32 = vsel %vm63_vm7, %v3979_v14, %v3984_v46 }
  0xe5   :  { %3386 = vmatprep.subr.bf16.mxu0 %v3385_v21 }
  0xe8   :  { %3388 = vmatpush3.bf16.msra.mxu0 %v3385_v21  ;;  %v587_v21 = vld [vmem:[#allocation5 + $0x220] sm:$0xff] }
  0xe9   :  { %3390 = vmatprep.subr.bf16.mxu0 %v3389_v24  ;;  %v3413_v50 = vpack.c.bf16 %v588_v22, %v587_v21  ;;  %v1223_v21 = vld [vmem:[#allocation5 + $0x510] sm:$0xff] }
  0xec   :  { %3392 = vmatpush3.bf16.msra.mxu0 %v3389_v24  ;;  %v593_v24 = vld [vmem:[#allocation5 + $0x250] sm:$0xff] }
  0xed   :  { %3394 = vmatprep.subr.bf16.mxu0 %v3393_v31  ;;  %v3425_v10 = vpack.c.bf16 %v594_v7, %v593_v24  ;;  %v699_v24 = vld [vmem:[#allocation5 + $0x2d0] sm:$0xff] }
  0xf0   :  { %3396 = vmatpush3.bf16.msra.mxu0 %v3393_v31  ;;  %v597_v31 = vld [vmem:[#allocation5 + $0x270] sm:$0xff] }
  0xf1   :  { %3398 = vmatprep.subr.bf16.mxu0 %v3397_v41 }
  0xf4   :  { %3400 = vmatpush3.bf16.msra.mxu0 %v3397_v41  ;;  %v690_v41 = vld [vmem:[#allocation5 + $0x288] sm:$0xff] }
  0xf5   :  { %3402 = vmatprep.subr.bf16.mxu0 %v3401_v37  ;;  %v3437_v42 = vpack.c.bf16 %v690_v41, %v689_v28  ;;  %v819_v28 = vld [vmem:[#allocation5 + $0x300] sm:$0xff]  ;;  %v820_v41 = vld [vmem:[#allocation5 + $0x308] sm:$0xff] }
  0xf8   :  { %3404 = vmatpush3.bf16.msra.mxu0 %v3401_v37  ;;  %v692_v37 = vld [vmem:[#allocation5 + $0x298] sm:$0xff] }
  0xf9   :  { %3406 = vmatprep.subr.bf16.mxu0 %v3405_v17  ;;  %v3441_v38 = vpack.c.bf16 %v692_v37, %v691_v36  ;;  %v821_v36 = vld [vmem:[#allocation5 + $0x310] sm:$0xff]  ;;  %v822_v37 = vld [vmem:[#allocation5 + $0x318] sm:$0xff] }
  0xfb   :  { %2740 = vmatmul.mubr.f32.vlgmr.msra.gmra.mrb[0].mxu0 %v469_v0  ;;  %v696_v0 = vld [vmem:[#allocation5 + $0x2b8] sm:$0xff] }
  0xfc   :  { %3408 = vmatpush3.bf16.msra.mxu0 %v3405_v17  ;;  %2742 = vmatprep.mubr.f32.mxu0 %v470_v20  ;;  %v694_v17 = vld [vmem:[#allocation5 + $0x2a8] sm:$0xff] }
  0xfd   :  { %3410 = vmatprep.subr.bf16.mxu0 %v3409_v40  ;;  %v3445_v18 = vpack.c.bf16 %v694_v17, %v693_v39  ;;  %v1222_v20 = vld [vmem:[#allocation5 + $0x508] sm:$0xff]  ;;  %v823_v39 = vld [vmem:[#allocation5 + $0x320] sm:$0xff] }
  0xfe   :  { %v824_v17 = vld [vmem:[#allocation5 + $0x328] sm:$0xff] }
  0xff   :  { %2743 = vmatmul.mubr.f32.gmra.mrb[2].mxu0 %v471_v49  ;;  %v1224_v49 = vld [vmem:[#allocation5 + $0x518] sm:$0xff] }
 0x100   :  { %3412 = vmatpush3.bf16.msra.mxu0 %v3409_v40  ;;  %2777 = vmatprep.mubr.f32.mxu0 %v4224_v3  ;;  %v3433_v3 = vpack.c.bf16 %v598_v35, %v597_v31  ;;  %v1221_v40 = vld [vmem:[#allocation5 + $0x500] sm:$0xff]  ;;  %v703_v31 = vld [vmem:[#allocation5 + $0x2f0] sm:$0xff]  ;;  %v704_v35 = vld [vmem:[#allocation5 + $0x2f8] sm:$0xff] }
 0x101   :  { %3414 = vmatprep.subr.bf16.mxu0 %v3413_v50  ;;  %v3565_v22 = vpack.c.bf16 %v1222_v20, %v1221_v40  ;;  %v826_v40 = vld [vmem:[#allocation5 + $0x338] sm:$0xff]  ;;  %v827_v20 = vld [vmem:[#allocation5 + $0x340] sm:$0xff] }
 0x103   :  { %3566 = vmatprep.subr.bf16.mxu1 %v3565_v22 }
 0x104   :  { %3416 = vmatpush3.bf16.msra.mxu0 %v3413_v50  ;;  %v3449_v50 = vpack.c.bf16 %v696_v0, %v695_v19  ;;  %3568 = vmatpush3.bf16.msra.mxu1 %v3565_v22  ;;  %v810_v19 = vsel %vm62_vm6, %v3974_v56, %v3969_v63  ;;  %v825_v0 = vld [vmem:[#allocation5 + $0x330] sm:$0xff]  ;;  %v832_v56 = vld [vmem:[#allocation5 + $0x368] sm:$0xff] }
 0x105   :  { %3418 = vmatprep.subr.bf16.mxu0 %v3417_v11  ;;  %v829_v22 = vld [vmem:[#allocation5 + $0x350] sm:$0xff] }
 0x108   :  { %3420 = vmatpush3.bf16.msra.mxu0 %v3417_v11  ;;  %v698_v11 = vld [vmem:[#allocation5 + $0x2c8] sm:$0xff] }
 0x109   :  { %3422 = vmatprep.subr.bf16.mxu0 %v3421_v9 }
 0x10c   :  { %3424 = vmatpush3.bf16.msra.mxu0 %v3421_v9  ;;  %v1228_v9 = vld [vmem:[#allocation5 + $0x538] sm:$0xff] }
 0x10d   :  { %3426 = vmatprep.subr.bf16.mxu0 %v3425_v10  ;;  %v3577_v7 = vpack.c.bf16 %v1228_v9, %v1227_v23  ;;  %v928_v23 = vld [vmem:[#allocation5 + $0x398] sm:$0xff]  ;;  %v811_v9 = vsel %vm62_vm6, %v3975_v48, %v3970_v61 }
 0x10e   :  { %v932_v61 = vld [vmem:[#allocation5 + $0x3b8] sm:$0xff] }
 0x110   :  { %3428 = vmatpush3.bf16.msra.mxu0 %v3425_v10 }
 0x111   :  { %3430 = vmatprep.subr.bf16.mxu0 %v3429_v55 }
 0x114   :  { %3432 = vmatpush3.bf16.msra.mxu0 %v3429_v55  ;;  %v3461_v55 = vpack.c.bf16 %v702_v52, %v701_v12  ;;  %v934_v12 = vld [vmem:[#allocation5 + $0x3c8] sm:$0xff]  ;;  %v935_v52 = vld [vmem:[#allocation5 + $0x3d0] sm:$0xff] }
 0x115   :  { %3434 = vmatprep.subr.bf16.mxu0 %v3433_v3  ;;  %v3521_v45 = vpack.c.bf16 %v936_v43, %v935_v52 }
 0x118   :  { %3436 = vmatpush3.bf16.msra.mxu0 %v3433_v3  ;;  %v3465_v3 = vpack.c.bf16 %v704_v35, %v703_v31  ;;  %v939_v35 = vld [vmem:[#allocation5 + $0x3f0] sm:$0xff] }
 0x119   :  { %3438 = vmatprep.subr.bf16.mxu0 %v3437_v42 }
 0x11b   :  { %2778 = vmatmul.mubr.f32.vlgmr.msra.gmra.mrb[0].mxu0 %v4226_v4  ;;  %v3569_v4 = vpack.c.bf16 %v1224_v49, %v1223_v21  ;;  %v830_v49 = vld [vmem:[#allocation5 + $0x358] sm:$0xff] }
 0x11c   :  { %3440 = vmatpush3.bf16.msra.mxu0 %v3437_v42  ;;  %2780 = vmatprep.mubr.f32.mxu0 %v4228_v5  ;;  %v697_v5 = vld [vmem:[#allocation5 + $0x2c0] sm:$0xff]  ;;  %v3469_v42 = vpack.c.bf16 %v820_v41, %v819_v28  ;;  %v1032_v41 = vld [vmem:[#allocation5 + $0x408] sm:$0xff] }
 0x11d   :  { %3442 = vmatprep.subr.bf16.mxu0 %v3441_v38  ;;  %3570 = vmatprep.subr.bf16.mxu1 %v3569_v4  ;;  %v3453_v13 = vpack.c.bf16 %v698_v11, %v697_v5  ;;  %v925_v5 = vld [vmem:[#allocation5 + $0x380] sm:$0xff]  ;;  %v926_v11 = vld [vmem:[#allocation5 + $0x388] sm:$0xff] }
 0x11e   :  { %3572 = vmatpush3.bf16.msra.mxu1 %v3569_v4  ;;  %v831_v4 = vld [vmem:[#allocation5 + $0x360] sm:$0xff] }
 0x11f   :  { %2781 = vmatmul.mubr.f32.gmra.mrb[2].mxu0 %v4231_v6  ;;  %v3573_v6 = vpack.c.bf16 %v1226_v53, %v1225_v51  ;;  %v3493_v63 = vpack.c.bf16 %v832_v56, %v831_v4  ;;  %v834_v51 = vld [vmem:[#allocation5 + $0x378] sm:$0xff]  ;;  %v1031_v28 = vld [vmem:[#allocation5 + $0x400] sm:$0xff] }
 0x120   :  { %3444 = vmatpush3.bf16.msra.mxu0 %v3441_v38  ;;  %2815 = vmatprep.mubr.f32.mxu0 %v4363_v58  ;;  %v700_v58 = vld [vmem:[#allocation5 + $0x2d8] sm:$0xff]  ;;  %v3473_v38 = vpack.c.bf16 %v822_v37, %v821_v36  ;;  %v1033_v36 = vld [vmem:[#allocation5 + $0x410] sm:$0xff]  ;;  %v1229_v56 = vld [vmem:[#allocation5 + $0x540] sm:$0xff] }
 0x121   :  { %3446 = vmatprep.subr.bf16.mxu0 %v3445_v18  ;;  %3574 = vmatprep.subr.bf16.mxu1 %v3573_v6  ;;  %v3457_v10 = vpack.c.bf16 %v700_v58, %v699_v24  ;;  %v812_v58 = vsel %vm62_vm6, %v3984_v46, %v3979_v14  ;;  %v3513_v46 = vpack.c.bf16 %v932_v61, %v931_v57  ;;  %v933_v14 = vld [vmem:[#allocation5 + $0x3c0] sm:$0xff]  ;;  %v1034_v37 = vld [vmem:[#allocation5 + $0x418] sm:$0xff] }
 0x122   :  { %3576 = vmatpush3.bf16.msra.mxu1 %v3573_v6  ;;  %v3501_v6 = vpack.c.bf16 %v926_v11, %v925_v5  ;;  %v3517_v44 = vpack.c.bf16 %v934_v12, %v933_v14  ;;  %v1046_v4 = vld [vmem:[#allocation5 + $0x478] sm:$0xff]  ;;  %v1233_v11 = vld [vmem:[#allocation5 + $0x560] sm:$0xff] }
 0x123   :  { %3578 = vmatprep.subr.bf16.mxu1 %v3577_v7 }
 0x124   :  { %3448 = vmatpush3.bf16.msra.mxu0 %v3445_v18  ;;  %v3477_v18 = vpack.c.bf16 %v824_v17, %v823_v39  ;;  %v1035_v39 = vld [vmem:[#allocation5 + $0x420] sm:$0xff]  ;;  %v1036_v17 = vld [vmem:[#allocation5 + $0x428] sm:$0xff] }
 0x125   :  { %3450 = vmatprep.subr.bf16.mxu0 %v3449_v50 }
 0x126   :  { %3580 = vmatpush3.bf16.msra.mxu1 %v3577_v7  ;;  %v929_v7 = vld [vmem:[#allocation5 + $0x3a0] sm:$0xff] }
 0x128   :  { %3452 = vmatpush3.bf16.msra.mxu0 %v3449_v50  ;;  %v3489_v50 = vpack.c.bf16 %v830_v49, %v829_v22  ;;  %v1043_v22 = vld [vmem:[#allocation5 + $0x460] sm:$0xff]  ;;  %v1044_v49 = vld [vmem:[#allocation5 + $0x468] sm:$0xff] }
 0x129   :  { %3454 = vmatprep.subr.bf16.mxu0 %v3453_v13 }
 0x12c   :  { %3456 = vmatpush3.bf16.msra.mxu0 %v3453_v13  ;;  %v927_v13 = vld [vmem:[#allocation5 + $0x390] sm:$0xff] }
 0x12d   :  { %3458 = vmatprep.subr.bf16.mxu0 %v3457_v10  ;;  %v3505_v24 = vpack.c.bf16 %v928_v23, %v927_v13  ;;  %v1236_v23 = vld [vmem:[#allocation5 + $0x578] sm:$0xff] }
 0x130   :  { %3460 = vmatpush3.bf16.msra.mxu0 %v3457_v10  ;;  %v930_v10 = vld [vmem:[#allocation5 + $0x3a8] sm:$0xff] }
 0x131   :  { %3462 = vmatprep.subr.bf16.mxu0 %v3461_v55  ;;  %v3509_v48 = vpack.c.bf16 %v930_v10, %v929_v7 }
 0x134   :  { %3464 = vmatpush3.bf16.msra.mxu0 %v3461_v55  ;;  %v938_v55 = vld [vmem:[#allocation5 + $0x3e8] sm:$0xff] }
 0x135   :  { %3466 = vmatprep.subr.bf16.mxu0 %v3465_v3  ;;  %v3525_v31 = vpack.c.bf16 %v938_v55, %v937_v60 }
 0x138   :  { %3468 = vmatpush3.bf16.msra.mxu0 %v3465_v3  ;;  %v940_v3 = vld [vmem:[#allocation5 + $0x3f8] sm:$0xff] }
 0x139   :  { %3470 = vmatprep.subr.bf16.mxu0 %v3469_v42 }
 0x13b   :  { %2816 = vmatmul.mubr.f32.vlgmr.msra.gmra.mrb[0].mxu0 %v4371_v59  ;;  %v3481_v59 = vpack.c.bf16 %v826_v40, %v825_v0  ;;  %v1038_v0 = vld [vmem:[#allocation5 + $0x438] sm:$0xff] }
 0x13c   :  { %2818 = vmatprep.mubr.f32.mxu0 %v4389_v15  ;;  %3472 = vmatpush3.bf16.msra.mxu0 %v3469_v42  ;;  %v828_v15 = vld [vmem:[#allocation5 + $0x348] sm:$0xff]  ;;  %v3533_v42 = vpack.c.bf16 %v1032_v41, %v1031_v28 }
 0x13d   :  { %3474 = vmatprep.subr.bf16.mxu0 %v3473_v38  ;;  %v3485_v21 = vpack.c.bf16 %v828_v15, %v827_v20  ;;  %v1040_v20 = vld [vmem:[#allocation5 + $0x448] sm:$0xff] }
 0x13f   :  { %2819 = vmatmul.mubr.f32.gmra.mrb[2].mxu0 %v4397_v16  ;;  %v833_v16 = vld [vmem:[#allocation5 + $0x370] sm:$0xff] }
 0x140   :  { %3476 = vmatpush3.bf16.msra.mxu0 %v3473_v38  ;;  %2853 = vmatprep.mubr.f32.mxu0 %v810_v19  ;;  %v3497_v53 = vpack.c.bf16 %v834_v51, %v833_v16  ;;  %v3537_v38 = vpack.c.bf16 %v1034_v37, %v1033_v36  ;;  %v1037_v19 = vld [vmem:[#allocation5 + $0x430] sm:$0xff]  ;;  %v1207_v36 = vld [vmem:[#allocation5 + $0x498] sm:$0xff] }
 0x141   :  { %3478 = vmatprep.subr.bf16.mxu0 %v3477_v18  ;;  %v3545_v40 = vpack.c.bf16 %v1038_v0, %v1037_v19  ;;  %v1231_v51 = vld [vmem:[#allocation5 + $0x550] sm:$0xff] }
 0x144   :  { %3480 = vmatpush3.bf16.msra.mxu0 %v3477_v18  ;;  %v3541_v18 = vpack.c.bf16 %v1036_v17, %v1035_v39 }
 0x145   :  { %3482 = vmatprep.subr.bf16.mxu0 %v3481_v59 }
 0x148   :  { %3484 = vmatpush3.bf16.msra.mxu0 %v3481_v59  ;;  %v1039_v59 = vld [vmem:[#allocation5 + $0x440] sm:$0xff] }
 0x149   :  { %3486 = vmatprep.subr.bf16.mxu0 %v3485_v21  ;;  %v3549_v15 = vpack.c.bf16 %v1040_v20, %v1039_v59  ;;  %v1209_v59 = vld [vmem:[#allocation5 + $0x4a8] sm:$0xff] }
 0x14c   :  { %3488 = vmatpush3.bf16.msra.mxu0 %v3485_v21  ;;  %v1042_v21 = vld [vmem:[#allocation5 + $0x458] sm:$0xff] }
 0x14d   :  { %3490 = vmatprep.subr.bf16.mxu0 %v3489_v50 }
 0x150   :  { %3492 = vmatpush3.bf16.msra.mxu0 %v3489_v50  ;;  %v1045_v50 = vld [vmem:[#allocation5 + $0x470] sm:$0xff] }
 0x151   :  { %3494 = vmatprep.subr.bf16.mxu0 %v3493_v63 }
 0x154   :  { %3496 = vmatpush3.bf16.msra.mxu0 %v3493_v63  ;;  %v1230_v63 = vld [vmem:[#allocation5 + $0x548] sm:$0xff] }
 0x155   :  { %3498 = vmatprep.subr.bf16.mxu0 %v3497_v53  ;;  %v3581_v16 = vpack.c.bf16 %v1230_v63, %v1229_v56 }
 0x157   :  { %3582 = vmatprep.subr.bf16.mxu1 %v3581_v16 }
 0x158   :  { %3500 = vmatpush3.bf16.msra.mxu0 %v3497_v53  ;;  %3584 = vmatpush3.bf16.msra.mxu1 %v3581_v16  ;;  %v1232_v53 = vld [vmem:[#allocation5 + $0x558] sm:$0xff] }
 0x159   :  { %3502 = vmatprep.subr.bf16.mxu0 %v3501_v6  ;;  %v3585_v5 = vpack.c.bf16 %v1232_v53, %v1231_v51 }
 0x15b   :  { %2854 = vmatmul.mubr.f32.vlgmr.msra.gmra.mrb[0].mxu0 %v811_v9  ;;  %3586 = vmatprep.subr.bf16.mxu1 %v3585_v5  ;;  %v1205_v9 = vld [vmem:[#allocation5 + $0x488] sm:$0xff] }
 0x15c   :  { %3504 = vmatpush3.bf16.msra.mxu0 %v3501_v6  ;;  %2856 = vmatprep.mubr.f32.mxu0 %v812_v58  ;;  %v1234_v6 = vld [vmem:[#allocation5 + $0x568] sm:$0xff]  ;;  %v2231_v58 = vld [vmem:[#allocation7] ss:$0 sm:$0xff] }
 0x15d   :  { %3506 = vmatprep.subr.bf16.mxu0 %v3505_v24  ;;  %3588 = vmatpush3.bf16.msra.mxu1 %v3585_v5  ;;  %v3589_v13 = vpack.c.bf16 %v1234_v6, %v1233_v11  ;;  %v1214_v5 = vld [vmem:[#allocation5 + $0x4d0] sm:$0xff]  ;;  %v1215_v11 = vld [vmem:[#allocation5 + $0x4d8] sm:$0xff] }
 0x15f   :  { %2857 = vmatmul.mubr.f32.gmra.mrb[2].mxu0 %v813_v47  ;;  %3590 = vmatprep.subr.bf16.mxu1 %v3589_v13 }
 0x160   :  { %3508 = vmatpush3.bf16.msra.mxu0 %v3505_v24  ;;  %2891 = vmatprep.mubr.f32.mxu0 %v4280_v62  ;;  %v3529_v62 = vpack.c.bf16 %v940_v3, %v939_v35 }
 0x161   :  { %3510 = vmatprep.subr.bf16.mxu0 %v3509_v48  ;;  %3592 = vmatpush3.bf16.msra.mxu1 %v3589_v13 }
 0x164   :  { %3512 = vmatpush3.bf16.msra.mxu0 %v3509_v48 }
 0x165   :  { %3514 = vmatprep.subr.bf16.mxu0 %v3513_v46 }
 0x168   :  { %3516 = vmatpush3.bf16.msra.mxu0 %v3513_v46 }
 0x169   :  { %3518 = vmatprep.subr.bf16.mxu0 %v3517_v44 }
 0x16c   :  { %3520 = vmatpush3.bf16.msra.mxu0 %v3517_v44 }
 0x16d   :  { %3522 = vmatprep.subr.bf16.mxu0 %v3521_v45 }
 0x170   :  { %3524 = vmatpush3.bf16.msra.mxu0 %v3521_v45 }
 0x171   :  { %3526 = vmatprep.subr.bf16.mxu0 %v3525_v31 }
 0x174   :  { %3528 = vmatpush3.bf16.msra.mxu0 %v3525_v31 }
 0x175   :  { %3530 = vmatprep.subr.bf16.mxu0 %v3529_v62 }
 0x178   :  { %3532 = vmatpush3.bf16.msra.mxu0 %v3529_v62 }
 0x179   :  { %3534 = vmatprep.subr.bf16.mxu0 %v3533_v42 }
 0x17b   :  { %2892 = vmatmul.mubr.f32.vlgmr.msra.gmra.mrb[0].mxu0 %v4286_v8  ;;  %v1041_v8 = vld [vmem:[#allocation5 + $0x450] sm:$0xff] }
 0x17c   :  { %3536 = vmatpush3.bf16.msra.mxu0 %v3533_v42  ;;  %2894 = vmatprep.mubr.f32.mxu0 %v4298_v26  ;;  %v3553_v26 = vpack.c.bf16 %v1042_v21, %v1041_v8  ;;  %v1206_v42 = vld [vmem:[#allocation5 + $0x490] sm:$0xff]  ;;  %v1211_v21 = vld [vmem:[#allocation5 + $0x4b8] sm:$0xff] }
 0x17d   :  { %3538 = vmatprep.subr.bf16.mxu0 %v3537_v38  ;;  %v1210_v8 = vld [vmem:[#allocation5 + $0x4b0] sm:$0xff] }
 0x17f   :  { %2895 = vmatmul.mubr.f32.gmra.mrb[2].mxu0 %v4302_v27  ;;  %v3557_v27 = vpack.c.bf16 %v1044_v49, %v1043_v22  ;;  %v3609_v22 = vpack.c.bf16 %v1211_v21, %v1210_v8 }
 0x180   :  { %3540 = vmatpush3.bf16.msra.mxu0 %v3537_v38  ;;  %2929 = vmatprep.mubr.f32.mxu0 %v4425_v30  ;;  %v3561_v30 = vpack.c.bf16 %v1046_v4, %v1045_v50  ;;  %v1212_v4 = vld [vmem:[#allocation5 + $0x4c0] sm:$0xff] }
 0x181   :  { %3542 = vmatprep.subr.bf16.mxu0 %v3541_v18 }
 0x184   :  { %3544 = vmatpush3.bf16.msra.mxu0 %v3541_v18  ;;  %v3601_v18 = vpack.c.bf16 %v1207_v36, %v1206_v42  ;;  %v1413_v42 = vld [vmem:[#allocation5 + $0x5a8] sm:$0xff] }
 0x185   :  { %3546 = vmatprep.subr.bf16.mxu0 %v3545_v40 }
 0x188   :  { %3548 = vmatpush3.bf16.msra.mxu0 %v3545_v40  ;;  %v1208_v40 = vld [vmem:[#allocation5 + $0x4a0] sm:$0xff] }
 0x189   :  { %3550 = vmatprep.subr.bf16.mxu0 %v3549_v15 }
 0x18c   :  { %3552 = vmatpush3.bf16.msra.mxu0 %v3549_v15  ;;  %v3605_v15 = vpack.c.bf16 %v1209_v59, %v1208_v40 }
 0x18d   :  { %3554 = vmatprep.subr.bf16.mxu0 %v3553_v26 }
 0x190   :  { %3556 = vmatpush3.bf16.msra.mxu0 %v3553_v26 }
 0x191   :  { %3558 = vmatprep.subr.bf16.mxu0 %v3557_v27 }
 0x194   :  { %3560 = vmatpush3.bf16.msra.mxu0 %v3557_v27 }
 0x195   :  { %3562 = vmatprep.subr.bf16.mxu0 %v3561_v30 }
 0x198   :  { %3564 = vmatpush3.bf16.msra.mxu0 %v3561_v30  ;;  %v1213_v30 = vld [vmem:[#allocation5 + $0x4c8] sm:$0xff] }
 0x199   :  { %v3613_v51 = vpack.c.bf16 %v1213_v30, %v1212_v4  ;;  %v1416_v30 = vld [vmem:[#allocation5 + $0x5c0] sm:$0xff] }
 0x19b   :  { %2930 = vmatmul.mubr.f32.vlgmr.msra.gmra.mrb[0].mxu0 %v4433_v33  ;;  %v1235_v33 = vld [vmem:[#allocation5 + $0x570] sm:$0xff] }
 0x19c   :  { %2932 = vmatprep.mubr.f32.mxu0 %v4461_v32  ;;  %v3593_v32 = vpack.c.bf16 %v1236_v23, %v1235_v33  ;;  %v3617_v33 = vpack.c.bf16 %v1215_v11, %v1214_v5 }
 0x19e   :  { %3594 = vmatprep.subr.bf16.mxu1 %v3593_v32 }
 0x19f   :  { %2933 = vmatmul.mubr.f32.gmra.mrb[2].mxu0 %v4469_v34  ;;  %3596 = vmatpush3.bf16.msra.mxu1 %v3593_v32  ;;  %v1204_v34 = vld [vmem:[#allocation5 + $0x480] sm:$0xff] }
 0x1a0   :  { %v3597_v24 = vpack.c.bf16 %v1205_v9, %v1204_v34  ;;  %v1216_v32 = vld [vmem:[#allocation5 + $0x4e0] sm:$0xff]  ;;  %v1217_v34 = vld [vmem:[#allocation5 + $0x4e8] sm:$0xff] }
 0x1a2   :  { %3598 = vmatprep.subr.bf16.mxu1 %v3597_v24 }
 0x26e   :  { %v2931_v7 = vpop.f32.mrb[0].mxu0 }
 0x26f   :  { %v1144_v10 = vadd.f32 %v2931_v7, %v2231_v58  ;;  %v1113_v47 = vpop.f32.mrb[1].mxu0  ;;  %v1408_v7 = vld [vmem:[#allocation5 + $0x580] sm:$0xff] }
 0x270   :  { %v1143_v48 = vadd.f32 %v2231_v58, %v1113_v47 }
 0x271   :  { %v1148_v57 = vmul.f32 0.01, %v1144_v10 }
 0x272   :  { %v1147_v61 = vmul.f32 0.01, %v1143_v48  ;;  %v2934_v46 = vpop.f32.mrb[2].mxu0 }
 0x273   :  { %v1146_v14 = vadd.f32 %v2934_v46, %v2231_v58  ;;  %v1123_v12 = vpop.f32.mrb[3].mxu0  ;;  %v4529_v52 = vmax.f32 %v1144_v10, %v1148_v57  ;;  %v1409_v10 = vld [vmem:[#allocation5 + $0x588] sm:$0xff]  ;;  %v1411_v46 = vld [vmem:[#allocation5 + $0x598] sm:$0xff] }
 0x274   :  { %v1145_v44 = vadd.f32 %v2231_v58, %v1123_v12  ;;  %v4531_v43 = vmax.f32 %v1143_v48, %v1147_v61  ;;  %v1218_v58 = vld [vmem:[#allocation5 + $0x4f0] sm:$0xff]  ;;  %v3629_v47 = vpack.c.bf16 %v1409_v10, %v1408_v7 }
 0x275   :  { %v1150_v45 = vmul.f32 0.01, %v1146_v14  ;;  %v1156_v3 = vrot.slane %v4529_v52, 7  ;;  %v1164_v50 = vrot.slane %v4529_v52, 1  ;;  %v3625_v25 = vpack.c.bf16 %v1219_v1, %v1218_v58  ;;  %v1410_v61 = vld [vmem:[#allocation5 + $0x590] sm:$0xff] }
 0x276   :  { %v1149_v60 = vmul.f32 0.01, %v1145_v44  ;;  %v1155_v35 = vrot.slane %v4531_v43, 7  ;;  %v4011_v49 = vpack.i.bf16 %v4529_v52, %v4531_v43  ;;  %v1163_v27 = vrot.slane %v4531_v43, 1 }
 0x277   :  { %v4533_v55 = vmax.f32 %v1146_v14, %v1150_v45 }
 0x278   :  { %v4535_v31 = vmax.f32 %v1145_v44, %v1149_v60  ;;  %v1161_v39 = vsel %vm97_vm0, %v1155_v35, %v1156_v3  ;;  %v4579_v6 = vsel %vm106_vm3, %v1163_v27, %v1164_v50 }
 0x279   :  { %v1158_v62 = vrot.slane %v4533_v55, 7  ;;  %v1166_v26 = vrot.slane %v4533_v55, 1 }
 0x27a   :  { %v1157_v28 = vrot.slane %v4535_v31, 7  ;;  %v1165_v2 = vrot.slane %v4535_v31, 1  ;;  %v4021_v16 = vpack.i.bf16 %v4533_v55, %v4535_v31 }
 0x27b   :  { %v1162_v41 = vsel %vm97_vm0, %v1158_v62, %v1155_v35  ;;  %v1170_v63 = vsel %vm106_vm3, %v1166_v26, %v1163_v27 }
 0x27c   :  { %v1160_v37 = vsel %vm97_vm0, %v1156_v3, %v1157_v28  ;;  %v1159_v0 = vsel %vm97_vm0, %v1157_v28, %v1158_v62  ;;  %v1168_v56 = vsel %vm106_vm3, %v1164_v50, %v1165_v2  ;;  %v4585_v54 = vsel %vm106_vm3, %v1165_v2, %v1166_v26 }
 0x27d   :  { %v1171_v38 = vsel %vm69_vm1, %v1160_v37, %v1162_v41  ;;  %v1173_v19 = vsel %vm75_vm2, %v1162_v41, %v1160_v37  ;;  %v4573_v53 = vsel %vm82_vm4, %v1170_v63, %v1168_v56  ;;  %v4589_v23 = vsel %vm88_vm5, %v1168_v56, %v1170_v63  ;;  %v1412_v41 = vld [vmem:[#allocation5 + $0x5a0] sm:$0xff]  ;;  %v1417_v56 = vld [vmem:[#allocation5 + $0x5c8] sm:$0xff] }
 0x27e   :  { %2967 = vmatprep.mubr.f32.mxu1 %v1171_v38  ;;  %v3991_v17 = vpack.i.bf16 %v1161_v39, %v1171_v38  ;;  %v4001_v20 = vpack.i.bf16 %v1159_v0, %v1173_v19  ;;  %v4031_v13 = vpack.i.bf16 %v4573_v53, %v4579_v6  ;;  %v4041_v9 = vpack.i.bf16 %v4589_v23, %v4585_v54 }
 0x27f   :  { %2968 = vmatmul.mubr.f32.vlgmr.msra.gmra.mrb[0].mxu1 %v1161_v39  ;;  %v3633_v3 = vpack.c.bf16 %v1411_v46, %v1410_v61  ;;  %v3645_v11 = vpack.c.bf16 %v1417_v56, %v1416_v30  ;;  %v1539_v30 = vld [vmem:[#allocation5 + $0x608] sm:$0xff] }
 0x280   :  { %3992 = vrot.lane.b32.xlu1 %v3991_v17, %s4147_s2  ;;  %3987 = vrot.lane.b32.xlu0 %v3991_v17, %s4143_s25 }
 0x281   :  { %2970 = vmatprep.mubr.f32.mxu1 %v1173_v19  ;;  %3600 = vmatpush3.bf16.msra.mxu1 %v3597_v24  ;;  %v3621_v24 = vpack.c.bf16 %v1217_v34, %v1216_v32  ;;  %v3637_v19 = vpack.c.bf16 %v1413_v42, %v1412_v41 }
 0x282   :  { %3602 = vmatprep.subr.bf16.mxu1 %v3601_v18 }
 0x283   :  { %2971 = vmatmul.mubr.f32.gmra.mrb[2].mxu1 %v1159_v0 }
 0x284   :  { %4002 = vrot.lane.b32.xlu1 %v4001_v20, %s4147_s2  ;;  %3997 = vrot.lane.b32.xlu0 %v4001_v20, %s4143_s25  ;;  %v1414_v20 = vld [vmem:[#allocation5 + $0x5b0] sm:$0xff] }
 0x285   :  { %3604 = vmatpush3.bf16.msra.mxu1 %v3601_v18 }
 0x286   :  { %3606 = vmatprep.subr.bf16.mxu1 %v3605_v15 }
 0x288   :  { %4012 = vrot.lane.b32.xlu1 %v4011_v49, %s4147_s2  ;;  %4007 = vrot.lane.b32.xlu0 %v4011_v49, %s4143_s25 }
 0x289   :  { %3608 = vmatpush3.bf16.msra.mxu1 %v3605_v15  ;;  %v1415_v15 = vld [vmem:[#allocation5 + $0x5b8] sm:$0xff] }
 0x28a   :  { %3610 = vmatprep.subr.bf16.mxu1 %v3609_v22 }
 0x28c   :  { %4022 = vrot.lane.b32.xlu1 %v4021_v16, %s4147_s2  ;;  %4017 = vrot.lane.b32.xlu0 %v4021_v16, %s4143_s25 }
 0x28d   :  { %3612 = vmatpush3.bf16.msra.mxu1 %v3609_v22  ;;  %v3641_v22 = vpack.c.bf16 %v1415_v15, %v1414_v20 }
 0x28e   :  { %3614 = vmatprep.subr.bf16.mxu1 %v3613_v51 }
 0x290   :  { %4032 = vrot.lane.b32.xlu1 %v4031_v13, %s4147_s2  ;;  %4027 = vrot.lane.b32.xlu0 %v4031_v13, %s4143_s25 }
 0x291   :  { %3616 = vmatpush3.bf16.msra.mxu1 %v3613_v51 }
 0x292   :  { %3618 = vmatprep.subr.bf16.mxu1 %v3617_v33 }
 0x294   :  { %4042 = vrot.lane.b32.xlu1 %v4041_v9, %s4147_s2  ;;  %4037 = vrot.lane.b32.xlu0 %v4041_v9, %s4143_s25  ;;  %v1418_v9 = vld [vmem:[#allocation5 + $0x5d0] sm:$0xff] }
 0x295   :  { %3620 = vmatpush3.bf16.msra.mxu1 %v3617_v33 }
 0x296   :  { %3622 = vmatprep.subr.bf16.mxu1 %v3621_v24 }
 0x299   :  { %3624 = vmatpush3.bf16.msra.mxu1 %v3621_v24  ;;  %v1419_v24 = vld [vmem:[#allocation5 + $0x5d8] sm:$0xff] }
 0x29a   :  { %3626 = vmatprep.subr.bf16.mxu1 %v3625_v25  ;;  %v3649_v10 = vpack.c.bf16 %v1419_v24, %v1418_v9  ;;  %v1541_v9 = vld [vmem:[#allocation5 + $0x618] sm:$0xff] }
 0x29d   :  { %3628 = vmatpush3.bf16.msra.mxu1 %v3625_v25 }
 0x29e   :  { %3630 = vmatprep.subr.bf16.mxu1 %v3629_v47 }
 0x2f2   :  { %v4597_v48 = vpop.permute.xlu1 %3992  ;;  %v4599_v57 = vpop.permute.xlu0 %3987 }
 0x2f3   :  { %v3995_v14 = vunpack.i.h.bf16 %v4597_v48  ;;  %v3994_v12 = vunpack.i.l.bf16 %v4597_v48  ;;  %v3990_v44 = vunpack.i.h.bf16 %v4599_v57  ;;  %v3989_v45 = vunpack.i.l.bf16 %v4599_v57  ;;  %v1544_v57 = vld [vmem:[#allocation5 + $0x630] sm:$0xff] }
 0x2f5   :  { %v1195_v60 = vsel %vm62_vm6, %v3994_v12, %v3989_v45  ;;  %v1196_v35 = vsel %vm62_vm6, %v3995_v14, %v3990_v44  ;;  %v1199_v59 = vsel %vm63_vm7, %v3989_v45, %v3994_v12  ;;  %v1420_v12 = vld [vmem:[#allocation5 + $0x5e0] sm:$0xff]  ;;  %v1421_v45 = vld [vmem:[#allocation5 + $0x5e8] sm:$0xff] }
 0x2f6   :  { %v4613_v62 = vpop.permute.xlu1 %4002  ;;  %v4615_v28 = vpop.permute.xlu0 %3997  ;;  %3005 = vmatprep.mubr.f32.mxu1 %v1195_v60 }
 0x2f7   :  { %v4005_v36 = vunpack.i.h.bf16 %v4613_v62  ;;  %v4004_v37 = vunpack.i.l.bf16 %v4613_v62  ;;  %v4000_v38 = vunpack.i.h.bf16 %v4615_v28  ;;  %v3999_v39 = vunpack.i.l.bf16 %v4615_v28  ;;  %3006 = vmatmul.mubr.f32.vlgmr.msra.gmra.mrb[0].mxu1 %v1196_v35  ;;  %v1546_v62 = vld [vmem:[#allocation5 + $0x640] sm:$0xff] }
 0x2f8   :  { %3632 = vmatpush3.bf16.msra.mxu1 %v3629_v47 }
 0x2f9   :  { %v1197_v17 = vsel %vm62_vm6, %v4004_v37, %v3999_v39  ;;  %3634 = vmatprep.subr.bf16.mxu1 %v3633_v3  ;;  %v1198_v18 = vsel %vm62_vm6, %v4005_v36, %v4000_v38  ;;  %v1202_v48 = vsel %vm63_vm7, %v4000_v38, %v4005_v36  ;;  %v1548_v36 = vld [vmem:[#allocation5 + $0x650] sm:$0xff]  ;;  %v1549_v38 = vld [vmem:[#allocation5 + $0x658] sm:$0xff] }
 0x2fa   :  { %v4633_v0 = vpop.permute.xlu1 %4012  ;;  %v4635_v40 = vpop.permute.xlu0 %4007  ;;  %3008 = vmatprep.mubr.f32.mxu1 %v1197_v17  ;;  %v3653_v17 = vpack.c.bf16 %v1421_v45, %v1420_v12  ;;  %v1200_v12 = vsel %vm63_vm7, %v3990_v44, %v3995_v14  ;;  %v1543_v45 = vld [vmem:[#allocation5 + $0x628] sm:$0xff]  ;;  %v1545_v14 = vld [vmem:[#allocation5 + $0x638] sm:$0xff] }
 0x2fb   :  { %v4015_v8 = vunpack.i.h.bf16 %v4633_v0  ;;  %v4014_v21 = vunpack.i.l.bf16 %v4633_v0  ;;  %v4010_v2 = vunpack.i.h.bf16 %v4635_v40  ;;  %v4009_v26 = vunpack.i.l.bf16 %v4635_v40  ;;  %3009 = vmatmul.mubr.f32.gmra.mrb[2].mxu1 %v1198_v18  ;;  %v1650_v40 = vld [vmem:[#allocation5 + $0x6b0] sm:$0xff] }
 0x2fc   :  { %3636 = vmatpush3.bf16.msra.mxu1 %v3633_v3  ;;  %3043 = vmatprep.mubr.f32.mxu1 %v1199_v59  ;;  %v1423_v59 = vld [vmem:[#allocation5 + $0x5f8] sm:$0xff] }
 0x2fd   :  { %3638 = vmatprep.subr.bf16.mxu1 %v3637_v19  ;;  %v4649_v49 = vsel %vm63_vm7, %v4009_v26, %v4014_v21  ;;  %v4657_v27 = vsel %vm63_vm7, %v4010_v2, %v4015_v8  ;;  %v1529_v44 = vsel %vm62_vm6, %v4014_v21, %v4009_v26  ;;  %v1552_v21 = vld [vmem:[#allocation5 + $0x670] sm:$0xff]  ;;  %v1553_v26 = vld [vmem:[#allocation5 + $0x678] sm:$0xff] }
 0x2fe   :  { %v4659_v50 = vpop.permute.xlu1 %4022  ;;  %v4661_v4 = vpop.permute.xlu0 %4017 }
 0x2ff   :  { %v4025_v63 = vunpack.i.h.bf16 %v4659_v50  ;;  %v4024_v16 = vunpack.i.l.bf16 %v4659_v50  ;;  %v4020_v51 = vunpack.i.h.bf16 %v4661_v4  ;;  %v4019_v5 = vunpack.i.l.bf16 %v4661_v4  ;;  %v1655_v4 = vld [vmem:[#allocation5 + $0x6d8] sm:$0xff] }
 0x300   :  { %3640 = vmatpush3.bf16.msra.mxu1 %v3637_v19  ;;  %v1422_v19 = vld [vmem:[#allocation5 + $0x5f0] sm:$0xff] }
 0x301   :  { %3642 = vmatprep.subr.bf16.mxu1 %v3641_v22  ;;  %v4673_v13 = vsel %vm63_vm7, %v4019_v5, %v4024_v16  ;;  %v4681_v33 = vsel %vm63_vm7, %v4020_v51, %v4025_v63  ;;  %v3657_v15 = vpack.c.bf16 %v1423_v59, %v1422_v19  ;;  %v3681_v59 = vpack.c.bf16 %v1549_v38, %v1548_v36  ;;  %v1750_v36 = vld [vmem:[#allocation5 + $0x700] sm:$0xff]  ;;  %v1751_v38 = vld [vmem:[#allocation5 + $0x708] sm:$0xff] }
 0x302   :  { %v4683_v32 = vpop.permute.xlu1 %4032  ;;  %v4685_v34 = vpop.permute.xlu0 %4027  ;;  %v1532_v0 = vsel %vm62_vm6, %v4025_v63, %v4020_v51  ;;  %v1657_v63 = vld [vmem:[#allocation5 + $0x6e8] sm:$0xff] }
 0x303   :  { %v4035_v58 = vunpack.i.h.bf16 %v4683_v32  ;;  %v4034_v1 = vunpack.i.l.bf16 %v4683_v32  ;;  %v4030_v25 = vunpack.i.h.bf16 %v4685_v34  ;;  %v4029_v7 = vunpack.i.l.bf16 %v4685_v34  ;;  %v1992_v34 = vld [vmem:[#allocation5 + $0x830] sm:$0xff] }
 0x304   :  { %3644 = vmatpush3.bf16.msra.mxu1 %v3641_v22  ;;  %v1538_v22 = vld [vmem:[#allocation5 + $0x600] sm:$0xff] }
 0x305   :  { %3646 = vmatprep.subr.bf16.mxu1 %v3645_v11  ;;  %v4697_v47 = vsel %vm63_vm7, %v4029_v7, %v4034_v1  ;;  %v4709_v60 = vsel %vm63_vm7, %v4030_v25, %v4035_v58  ;;  %v3661_v56 = vpack.c.bf16 %v1539_v30, %v1538_v22  ;;  %v1551_v22 = vld [vmem:[#allocation5 + $0x668] sm:$0xff] }
 0x306   :  { %v4699_v61 = vpop.permute.xlu1 %4042  ;;  %v4701_v46 = vpop.permute.xlu0 %4037 }
 0x307   :  { %v4045_v35 = vunpack.i.h.bf16 %v4699_v61  ;;  %v4044_v3 = vunpack.i.l.bf16 %v4699_v61  ;;  %v4040_v41 = vunpack.i.h.bf16 %v4701_v46  ;;  %v4039_v42 = vunpack.i.l.bf16 %v4701_v46  ;;  %v1997_v46 = vld [vmem:[#allocation5 + $0x858] sm:$0xff] }
 0x308   :  { %3648 = vmatpush3.bf16.msra.mxu1 %v3645_v11  ;;  %v1540_v11 = vld [vmem:[#allocation5 + $0x610] sm:$0xff] }
 0x309   :  { %3650 = vmatprep.subr.bf16.mxu1 %v3649_v10  ;;  %v4721_v18 = vsel %vm63_vm7, %v4039_v42, %v4044_v3  ;;  %v4729_v20 = vsel %vm63_vm7, %v4040_v41, %v4045_v35  ;;  %v3665_v24 = vpack.c.bf16 %v1541_v9, %v1540_v11  ;;  %v1644_v11 = vld [vmem:[#allocation5 + $0x680] sm:$0xff]  ;;  %v1645_v9 = vld [vmem:[#allocation5 + $0x688] sm:$0xff]  ;;  %v1874_v32 = vsel %vm62_vm6, %v4045_v35, %v4040_v41 }
 0x30a   :  { %v1999_v35 = vld [vmem:[#allocation5 + $0x868] sm:$0xff] }
 0x30b   :  { %v3813_v41 = vpack.c.bf16 %v1999_v35, %v1998_v29 }
 0x30c   :  { %3652 = vmatpush3.bf16.msra.mxu1 %v3649_v10  ;;  %v1542_v10 = vld [vmem:[#allocation5 + $0x620] sm:$0xff] }
 0x30d   :  { %3654 = vmatprep.subr.bf16.mxu1 %v3653_v17  ;;  %v3669_v19 = vpack.c.bf16 %v1543_v45, %v1542_v10  ;;  %v1647_v10 = vld [vmem:[#allocation5 + $0x698] sm:$0xff] }
 0x310   :  { %3656 = vmatpush3.bf16.msra.mxu1 %v3653_v17  ;;  %v1201_v17 = vsel %vm63_vm7, %v3999_v39, %v4004_v37  ;;  %v3673_v37 = vpack.c.bf16 %v1545_v14, %v1544_v57  ;;  %v1547_v39 = vld [vmem:[#allocation5 + $0x648] sm:$0xff]  ;;  %v1531_v57 = vsel %vm62_vm6, %v4024_v16, %v4019_v5  ;;  %v1652_v16 = vld [vmem:[#allocation5 + $0x6c0] sm:$0xff] }
 0x311   :  { %3658 = vmatprep.subr.bf16.mxu1 %v3657_v15  ;;  %v3677_v28 = vpack.c.bf16 %v1547_v39, %v1546_v62  ;;  %v1653_v5 = vld [vmem:[#allocation5 + $0x6c8] sm:$0xff]  ;;  %v1656_v62 = vld [vmem:[#allocation5 + $0x6e0] sm:$0xff]  ;;  %v1658_v39 = vld [vmem:[#allocation5 + $0x6f0] sm:$0xff] }
 0x312   :  { %v3717_v51 = vpack.c.bf16 %v1657_v63, %v1656_v62  ;;  %v1887_v62 = vld [vmem:[#allocation5 + $0x7b8] sm:$0xff]  ;;  %v1871_v63 = vsel %vm62_vm6, %v4034_v1, %v4029_v7  ;;  %v1894_v1 = vld [vmem:[#allocation5 + $0x7f0] sm:$0xff] }
 0x313   :  { %v1895_v7 = vld [vmem:[#allocation5 + $0x7f8] sm:$0xff] }
 0x314   :  { %3660 = vmatpush3.bf16.msra.mxu1 %v3657_v15  ;;  %v1550_v15 = vld [vmem:[#allocation5 + $0x660] sm:$0xff] }
 0x315   :  { %3662 = vmatprep.subr.bf16.mxu1 %v3661_v56  ;;  %v3685_v30 = vpack.c.bf16 %v1551_v22, %v1550_v15  ;;  %v1752_v15 = vld [vmem:[#allocation5 + $0x710] sm:$0xff]  ;;  %v1753_v22 = vld [vmem:[#allocation5 + $0x718] sm:$0xff] }
 0x317   :  { %3044 = vmatmul.mubr.f32.vlgmr.msra.gmra.mrb[0].mxu1 %v1200_v12  ;;  %v1646_v12 = vld [vmem:[#allocation5 + $0x690] sm:$0xff] }
 0x318   :  { %3046 = vmatprep.mubr.f32.mxu1 %v1201_v17  ;;  %3664 = vmatpush3.bf16.msra.mxu1 %v3661_v56  ;;  %v3689_v56 = vpack.c.bf16 %v1553_v26, %v1552_v21  ;;  %v3697_v45 = vpack.c.bf16 %v1647_v10, %v1646_v12  ;;  %v1530_v17 = vsel %vm62_vm6, %v4015_v8, %v4010_v2  ;;  %v1651_v8 = vld [vmem:[#allocation5 + $0x6b8] sm:$0xff]  ;;  %v1754_v21 = vld [vmem:[#allocation5 + $0x720] sm:$0xff]  ;;  %v1755_v26 = vld [vmem:[#allocation5 + $0x728] sm:$0xff] }
 0x319   :  { %3666 = vmatprep.subr.bf16.mxu1 %v3665_v24  ;;  %v3705_v2 = vpack.c.bf16 %v1651_v8, %v1650_v40  ;;  %v1758_v12 = vld [vmem:[#allocation5 + $0x740] sm:$0xff]  ;;  %v1759_v10 = vld [vmem:[#allocation5 + $0x748] sm:$0xff] }
 0x31a   :  { %v1881_v40 = vld [vmem:[#allocation5 + $0x788] sm:$0xff] }
 0x31b   :  { %3047 = vmatmul.mubr.f32.gmra.mrb[2].mxu1 %v1202_v48  ;;  %v1649_v48 = vld [vmem:[#allocation5 + $0x6a8] sm:$0xff] }
 0x31c   :  { %3668 = vmatpush3.bf16.msra.mxu1 %v3665_v24  ;;  %3081 = vmatprep.mubr.f32.mxu1 %v1529_v44  ;;  %v3693_v24 = vpack.c.bf16 %v1645_v9, %v1644_v11  ;;  %v3709_v44 = vpack.c.bf16 %v1653_v5, %v1652_v16  ;;  %v1756_v11 = vld [vmem:[#allocation5 + $0x730] sm:$0xff]  ;;  %v1757_v9 = vld [vmem:[#allocation5 + $0x738] sm:$0xff] }
 0x31d   :  { %3670 = vmatprep.subr.bf16.mxu1 %v3669_v19  ;;  %v1883_v16 = vld [vmem:[#allocation5 + $0x798] sm:$0xff] }
 0x320   :  { %3672 = vmatpush3.bf16.msra.mxu1 %v3669_v19  ;;  %v1648_v19 = vld [vmem:[#allocation5 + $0x6a0] sm:$0xff] }
 0x321   :  { %3674 = vmatprep.subr.bf16.mxu1 %v3673_v37  ;;  %v3701_v14 = vpack.c.bf16 %v1649_v48, %v1648_v19  ;;  %v1762_v19 = vld [vmem:[#allocation5 + $0x760] sm:$0xff]  ;;  %v1763_v48 = vld [vmem:[#allocation5 + $0x768] sm:$0xff] }
 0x324   :  { %3676 = vmatpush3.bf16.msra.mxu1 %v3673_v37  ;;  %v1654_v37 = vld [vmem:[#allocation5 + $0x6d0] sm:$0xff] }
 0x325   :  { %3678 = vmatprep.subr.bf16.mxu1 %v3677_v28  ;;  %v3713_v50 = vpack.c.bf16 %v1655_v4, %v1654_v37  ;;  %v1885_v37 = vld [vmem:[#allocation5 + $0x7a8] sm:$0xff] }
 0x328   :  { %3680 = vmatpush3.bf16.msra.mxu1 %v3677_v28  ;;  %v1659_v28 = vld [vmem:[#allocation5 + $0x6f8] sm:$0xff] }
 0x329   :  { %3682 = vmatprep.subr.bf16.mxu1 %v3681_v59 }
 0x32c   :  { %3684 = vmatpush3.bf16.msra.mxu1 %v3681_v59  ;;  %v3725_v59 = vpack.c.bf16 %v1751_v38, %v1750_v36  ;;  %v1892_v36 = vld [vmem:[#allocation5 + $0x7e0] sm:$0xff]  ;;  %v1893_v38 = vld [vmem:[#allocation5 + $0x7e8] sm:$0xff] }
 0x32d   :  { %3686 = vmatprep.subr.bf16.mxu1 %v3685_v30 }
 0x330   :  { %3688 = vmatpush3.bf16.msra.mxu1 %v3685_v30  ;;  %v3729_v30 = vpack.c.bf16 %v1753_v22, %v1752_v15  ;;  %v3785_v15 = vpack.c.bf16 %v1895_v7, %v1894_v1  ;;  %v1986_v22 = vld [vmem:[#allocation5 + $0x800] sm:$0xff] }
 0x331   :  { %3690 = vmatprep.subr.bf16.mxu1 %v3689_v56 }
 0x334   :  { %3692 = vmatpush3.bf16.msra.mxu1 %v3689_v56  ;;  %v3733_v56 = vpack.c.bf16 %v1755_v26, %v1754_v21  ;;  %v1988_v26 = vld [vmem:[#allocation5 + $0x810] sm:$0xff] }
 0x335   :  { %3694 = vmatprep.subr.bf16.mxu1 %v3693_v24 }
 0x337   :  { %3082 = vmatmul.mubr.f32.vlgmr.msra.gmra.mrb[0].mxu1 %v1530_v17  ;;  %v1761_v17 = vld [vmem:[#allocation5 + $0x758] sm:$0xff] }
 0x338   :  { %3084 = vmatprep.mubr.f32.mxu1 %v1531_v57  ;;  %3696 = vmatpush3.bf16.msra.mxu1 %v3693_v24  ;;  %v3737_v24 = vpack.c.bf16 %v1757_v9, %v1756_v11  ;;  %v1764_v57 = vld [vmem:[#allocation5 + $0x770] sm:$0xff]  ;;  %v1872_v9 = vsel %vm62_vm6, %v4035_v58, %v4030_v25  ;;  %v1993_v58 = vld [vmem:[#allocation5 + $0x838] sm:$0xff] }
 0x339   :  { %3698 = vmatprep.subr.bf16.mxu1 %v3697_v45  ;;  %v3801_v25 = vpack.c.bf16 %v1993_v58, %v1992_v34 }
 0x33b   :  { %3085 = vmatmul.mubr.f32.gmra.mrb[2].mxu1 %v1532_v0  ;;  %v1880_v0 = vld [vmem:[#allocation5 + $0x780] sm:$0xff] }
 0x33c   :  { %3700 = vmatpush3.bf16.msra.mxu1 %v3697_v45  ;;  %3119 = vmatprep.mubr.f32.mxu1 %v4531_v43  ;;  %v3721_v43 = vpack.c.bf16 %v1659_v28, %v1658_v39  ;;  %v3741_v45 = vpack.c.bf16 %v1759_v10, %v1758_v12  ;;  %v3757_v8 = vpack.c.bf16 %v1881_v40, %v1880_v0  ;;  %v1890_v28 = vld [vmem:[#allocation5 + $0x7d0] sm:$0xff]  ;;  %v1991_v12 = vld [vmem:[#allocation5 + $0x828] sm:$0xff]  ;;  %v2096_v40 = vld [vmem:[#allocation5 + $0x8a0] sm:$0xff] }
 0x33d   :  { %3702 = vmatprep.subr.bf16.mxu1 %v3701_v14  ;;  %v1873_v10 = vsel %vm62_vm6, %v4044_v3, %v4039_v42  ;;  %v1994_v3 = vld [vmem:[#allocation5 + $0x840] sm:$0xff]  ;;  %v1995_v42 = vld [vmem:[#allocation5 + $0x848] sm:$0xff] }
 0x340   :  { %3704 = vmatpush3.bf16.msra.mxu1 %v3701_v14  ;;  %v1765_v14 = vld [vmem:[#allocation5 + $0x778] sm:$0xff] }
 0x341   :  { %3706 = vmatprep.subr.bf16.mxu1 %v3705_v2 }
 0x344   :  { %3708 = vmatpush3.bf16.msra.mxu1 %v3705_v2  ;;  %v1882_v2 = vld [vmem:[#allocation5 + $0x790] sm:$0xff] }
 0x345   :  { %3710 = vmatprep.subr.bf16.mxu1 %v3709_v44  ;;  %v3761_v5 = vpack.c.bf16 %v1883_v16, %v1882_v2  ;;  %v2098_v16 = vld [vmem:[#allocation5 + $0x8b0] sm:$0xff] }
 0x348   :  { %3712 = vmatpush3.bf16.msra.mxu1 %v3709_v44  ;;  %v1884_v44 = vld [vmem:[#allocation5 + $0x7a0] sm:$0xff] }
 0x349   :  { %3714 = vmatprep.subr.bf16.mxu1 %v3713_v50  ;;  %v3765_v4 = vpack.c.bf16 %v1885_v37, %v1884_v44  ;;  %v2100_v37 = vld [vmem:[#allocation5 + $0x8c0] sm:$0xff] }
 0x34c   :  { %3716 = vmatpush3.bf16.msra.mxu1 %v3713_v50  ;;  %v1886_v50 = vld [vmem:[#allocation5 + $0x7b0] sm:$0xff] }
 0x34d   :  { %3718 = vmatprep.subr.bf16.mxu1 %v3717_v51 }
 0x350   :  { %3720 = vmatpush3.bf16.msra.mxu1 %v3717_v51  ;;  %v1888_v51 = vld [vmem:[#allocation5 + $0x7c0] sm:$0xff] }
 0x351   :  { %3722 = vmatprep.subr.bf16.mxu1 %v3721_v43 }
 0x354   :  { %3724 = vmatpush3.bf16.msra.mxu1 %v3721_v43  ;;  %v1891_v43 = vld [vmem:[#allocation5 + $0x7d8] sm:$0xff] }
 0x355   :  { %3726 = vmatprep.subr.bf16.mxu1 %v3725_v59 }
 0x357   :  { %3120 = vmatmul.mubr.f32.vlgmr.msra.gmra.mrb[0].mxu1 %v4529_v52  ;;  %v1760_v52 = vld [vmem:[#allocation5 + $0x750] sm:$0xff] }
 0x358   :  { %3122 = vmatprep.mubr.f32.mxu1 %v4535_v31  ;;  %3728 = vmatpush3.bf16.msra.mxu1 %v3725_v59  ;;  %v3745_v31 = vpack.c.bf16 %v1761_v17, %v1760_v52  ;;  %v3781_v59 = vpack.c.bf16 %v1893_v38, %v1892_v36  ;;  %v3805_v52 = vpack.c.bf16 %v1995_v42, %v1994_v3  ;;  %v1996_v17 = vld [vmem:[#allocation5 + $0x850] sm:$0xff] }
 0x359   :  { %3730 = vmatprep.subr.bf16.mxu1 %v3729_v30  ;;  %v3809_v61 = vpack.c.bf16 %v1997_v46, %v1996_v17 }
 0x35b   :  { %3123 = vmatmul.mubr.f32.gmra.mrb[2].mxu1 %v4533_v55  ;;  %v3749_v55 = vpack.c.bf16 %v1763_v48, %v1762_v19  ;;  %v2001_v19 = vld [vmem:[#allocation5 + $0x878] sm:$0xff]  ;;  %v2092_v48 = vld [vmem:[#allocation5 + $0x880] sm:$0xff] }
 0x35c   :  { %3732 = vmatpush3.bf16.msra.mxu1 %v3729_v30  ;;  %3157 = vmatprep.mubr.f32.mxu1 %v4649_v49  ;;  %v3753_v49 = vpack.c.bf16 %v1765_v14, %v1764_v57  ;;  %v1987_v30 = vld [vmem:[#allocation5 + $0x808] sm:$0xff]  ;;  %v2094_v14 = vld [vmem:[#allocation5 + $0x890] sm:$0xff] }
 0x35d   :  { %3734 = vmatprep.subr.bf16.mxu1 %v3733_v56  ;;  %v3789_v21 = vpack.c.bf16 %v1987_v30, %v1986_v22 }
 0x360   :  { %3736 = vmatpush3.bf16.msra.mxu1 %v3733_v56  ;;  %v1989_v56 = vld [vmem:[#allocation5 + $0x818] sm:$0xff] }
 0x361   :  { %3738 = vmatprep.subr.bf16.mxu1 %v3737_v24  ;;  %v3793_v11 = vpack.c.bf16 %v1989_v56, %v1988_v26 }
 0x364   :  { %3740 = vmatpush3.bf16.msra.mxu1 %v3737_v24  ;;  %v1990_v24 = vld [vmem:[#allocation5 + $0x820] sm:$0xff] }
 0x365   :  { %3742 = vmatprep.subr.bf16.mxu1 %v3741_v45 }
 0x368   :  { %3744 = vmatpush3.bf16.msra.mxu1 %v3741_v45  ;;  %v3797_v45 = vpack.c.bf16 %v1991_v12, %v1990_v24 }
 0x369   :  { %3746 = vmatprep.subr.bf16.mxu1 %v3745_v31 }
 0x36c   :  { %3748 = vmatpush3.bf16.msra.mxu1 %v3745_v31  ;;  %v2000_v31 = vld [vmem:[#allocation5 + $0x870] sm:$0xff] }
 0x36d   :  { %3750 = vmatprep.subr.bf16.mxu1 %v3749_v55 }
 0x370   :  { %3752 = vmatpush3.bf16.msra.mxu1 %v3749_v55  ;;  %v2093_v55 = vld [vmem:[#allocation5 + $0x888] sm:$0xff] }
 0x371   :  { %3754 = vmatprep.subr.bf16.mxu1 %v3753_v49  ;;  %v3821_v57 = vpack.c.bf16 %v2093_v55, %v2092_v48 }
 0x374   :  { %3756 = vmatpush3.bf16.msra.mxu1 %v3753_v49  ;;  %v2095_v49 = vld [vmem:[#allocation5 + $0x898] sm:$0xff] }
 0x375   :  { %3758 = vmatprep.subr.bf16.mxu1 %v3757_v8  ;;  %v3825_v0 = vpack.c.bf16 %v2095_v49, %v2094_v14 }
 0x377   :  { %3158 = vmatmul.mubr.f32.vlgmr.msra.gmra.mrb[0].mxu1 %v4657_v27  ;;  %v3769_v27 = vpack.c.bf16 %v1887_v62, %v1886_v50  ;;  %v2103_v62 = vld [vmem:[#allocation5 + $0x8d8] sm:$0xff] }
 0x378   :  { %3160 = vmatprep.mubr.f32.mxu1 %v4673_v13  ;;  %3760 = vmatpush3.bf16.msra.mxu1 %v3757_v8  ;;  %v1889_v13 = vld [vmem:[#allocation5 + $0x7c8] sm:$0xff] }
 0x379   :  { %3762 = vmatprep.subr.bf16.mxu1 %v3761_v5  ;;  %v3773_v39 = vpack.c.bf16 %v1889_v13, %v1888_v51  ;;  %v2097_v8 = vld [vmem:[#allocation5 + $0x8a8] sm:$0xff]  ;;  %v2106_v51 = vld [vmem:[#allocation5 + $0x8f0] sm:$0xff]  ;;  %v2107_v13 = vld [vmem:[#allocation5 + $0x8f8] sm:$0xff] }
 0x37a   :  { %v3829_v2 = vpack.c.bf16 %v2097_v8, %v2096_v40 }
 0x37b   :  { %3161 = vmatmul.mubr.f32.gmra.mrb[2].mxu1 %v4681_v33  ;;  %v3777_v33 = vpack.c.bf16 %v1891_v43, %v1890_v28 }
 0x37c   :  { %3764 = vmatpush3.bf16.msra.mxu1 %v3761_v5  ;;  %3195 = vmatprep.mubr.f32.mxu1 %v1871_v63  ;;  %v2099_v5 = vld [vmem:[#allocation5 + $0x8b8] sm:$0xff]  ;;  %v2104_v63 = vld [vmem:[#allocation5 + $0x8e0] sm:$0xff] }
 0x37d   :  { %3766 = vmatprep.subr.bf16.mxu1 %v3765_v4  ;;  %v3833_v44 = vpack.c.bf16 %v2099_v5, %v2098_v16 }
 0x380   :  { %3768 = vmatpush3.bf16.msra.mxu1 %v3765_v4  ;;  %v2101_v4 = vld [vmem:[#allocation5 + $0x8c8] sm:$0xff] }
 0x381   :  { %3770 = vmatprep.subr.bf16.mxu1 %v3769_v27  ;;  %v3837_v50 = vpack.c.bf16 %v2101_v4, %v2100_v37 }
 0x384   :  { %3772 = vmatpush3.bf16.msra.mxu1 %v3769_v27  ;;  %v2105_v27 = vld [vmem:[#allocation5 + $0x8e8] sm:$0xff] }
 0x385   :  { %3774 = vmatprep.subr.bf16.mxu1 %v3773_v39 }
 0x388   :  { %3776 = vmatpush3.bf16.msra.mxu1 %v3773_v39  ;;  %v2232_v39 = vld [vmem:[#allocation7 + $0x1] ss:$0 sm:$0xff] }
 0x389   :  { %3778 = vmatprep.subr.bf16.mxu1 %v3777_v33 }
 0x38c   :  { %3780 = vmatpush3.bf16.msra.mxu1 %v3777_v33 }
 0x38d   :  { %3782 = vmatprep.subr.bf16.mxu1 %v3781_v59 }
 0x390   :  { %3784 = vmatpush3.bf16.msra.mxu1 %v3781_v59 }
 0x391   :  { %3786 = vmatprep.subr.bf16.mxu1 %v3785_v15 }
 0x394   :  { %3788 = vmatpush3.bf16.msra.mxu1 %v3785_v15 }
 0x395   :  { %3790 = vmatprep.subr.bf16.mxu1 %v3789_v21 }
 0x397   :  { %3196 = vmatmul.mubr.f32.vlgmr.msra.gmra.mrb[0].mxu1 %v1872_v9 }
 0x398   :  { %3198 = vmatprep.mubr.f32.mxu1 %v1873_v10  ;;  %3792 = vmatpush3.bf16.msra.mxu1 %v3789_v21 }
 0x399   :  { %3794 = vmatprep.subr.bf16.mxu1 %v3793_v11 }
 0x39b   :  { %3199 = vmatmul.mubr.f32.gmra.mrb[2].mxu1 %v1874_v32 }
 0x39c   :  { %3796 = vmatpush3.bf16.msra.mxu1 %v3793_v11  ;;  %3233 = vmatprep.mubr.f32.mxu1 %v4579_v6  ;;  %v3817_v6 = vpack.c.bf16 %v2001_v19, %v2000_v31 }
 0x39d   :  { %3798 = vmatprep.subr.bf16.mxu1 %v3797_v45 }
 0x3a0   :  { %3800 = vmatpush3.bf16.msra.mxu1 %v3797_v45 }
 0x3a1   :  { %3802 = vmatprep.subr.bf16.mxu1 %v3801_v25 }
 0x3a4   :  { %3804 = vmatpush3.bf16.msra.mxu1 %v3801_v25 }
 0x3a5   :  { %3806 = vmatprep.subr.bf16.mxu1 %v3805_v52 }
 0x3a8   :  { %3808 = vmatpush3.bf16.msra.mxu1 %v3805_v52 }
 0x3a9   :  { %3810 = vmatprep.subr.bf16.mxu1 %v3809_v61 }
 0x3ac   :  { %3812 = vmatpush3.bf16.msra.mxu1 %v3809_v61 }
 0x3ad   :  { %3814 = vmatprep.subr.bf16.mxu1 %v3813_v41 }
 0x3b0   :  { %3816 = vmatpush3.bf16.msra.mxu1 %v3813_v41 }
 0x3b1   :  { %3818 = vmatprep.subr.bf16.mxu1 %v3817_v6 }
 0x3b4   :  { %3820 = vmatpush3.bf16.msra.mxu1 %v3817_v6 }
 0x3b5   :  { %3822 = vmatprep.subr.bf16.mxu1 %v3821_v57 }
 0x3b7   :  { %3234 = vmatmul.mubr.f32.vlgmr.msra.gmra.mrb[0].mxu1 %v4573_v53  ;;  %v2102_v53 = vld [vmem:[#allocation5 + $0x8d0] sm:$0xff] }
 0x3b8   :  { %3236 = vmatprep.mubr.f32.mxu1 %v4585_v54  ;;  %3824 = vmatpush3.bf16.msra.mxu1 %v3821_v57  ;;  %v3841_v54 = vpack.c.bf16 %v2103_v62, %v2102_v53 }
 0x3b9   :  { %3826 = vmatprep.subr.bf16.mxu1 %v3825_v0 }
 0x3bb   :  { %3237 = vmatmul.mubr.f32.gmra.mrb[2].mxu1 %v4589_v23  ;;  %v3845_v23 = vpack.c.bf16 %v2105_v27, %v2104_v63 }
 0x3bc   :  { %3828 = vmatpush3.bf16.msra.mxu1 %v3825_v0  ;;  %3271 = vmatprep.mubr.f32.mxu1 %v4697_v47  ;;  %v3849_v47 = vpack.c.bf16 %v2107_v13, %v2106_v51 }
 0x3bd   :  { %3830 = vmatprep.subr.bf16.mxu1 %v3829_v2 }
 0x3c0   :  { %3832 = vmatpush3.bf16.msra.mxu1 %v3829_v2 }
 0x3c1   :  { %3834 = vmatprep.subr.bf16.mxu1 %v3833_v44 }
 0x3c4   :  { %3836 = vmatpush3.bf16.msra.mxu1 %v3833_v44 }
 0x3c5   :  { %3838 = vmatprep.subr.bf16.mxu1 %v3837_v50 }
 0x3c8   :  { %3840 = vmatpush3.bf16.msra.mxu1 %v3837_v50 }
 0x3c9   :  { %3842 = vmatprep.subr.bf16.mxu1 %v3841_v54 }
 0x3cc   :  { %3844 = vmatpush3.bf16.msra.mxu1 %v3841_v54 }
 0x3cd   :  { %3846 = vmatprep.subr.bf16.mxu1 %v3845_v23 }
 0x3d0   :  { %3848 = vmatpush3.bf16.msra.mxu1 %v3845_v23 }
 0x3d1   :  { %3850 = vmatprep.subr.bf16.mxu1 %v3849_v47 }
 0x3d4   :  { %3852 = vmatpush3.bf16.msra.mxu1 %v3849_v47 }
 0x3d7   :  { %3272 = vmatmul.mubr.f32.vlgmr.msra.gmra.mrb[0].mxu1 %v4709_v60 }
 0x3d8   :  { %3274 = vmatprep.mubr.f32.mxu1 %v4721_v18 }
 0x3db   :  { %3275 = vmatmul.mubr.f32.gmra.mrb[2].mxu1 %v4729_v20 }
 0x4aa   :  { %v3273_v28 = vpop.f32.mrb[0].mxu1 }
 0x4ab   :  { %v2206_v43 = vadd.f32 %v3273_v28, %v2232_v39  ;;  %v2174_v33 = vpop.f32.mrb[1].mxu1 }
 0x4ac   :  { %v2205_v36 = vadd.f32 %v2232_v39, %v2174_v33 }
 0x4ad   :  { %2210 = vst [vmem:[#allocation8 + $0x8] sm:$0xff] %v2206_v43 }
 0x4ae   :  { %2209 = vst [vmem:[#allocation8] sm:$0xff] %v2205_v36  ;;  %v3276_v38 = vpop.f32.mrb[2].mxu1 }
 0x4af   :  { %v2208_v59 = vadd.f32 %v3276_v38, %v2232_v39  ;;  %v2184_v1 = vpop.f32.mrb[3].mxu1 }
 0x4b0   :  { %v2207_v7 = vadd.f32 %v2232_v39, %v2184_v1 }
 0x4b1   :  { %2212 = vst [vmem:[#allocation8 + $0x18] sm:$0xff] %v2208_v59 }
 0x4b2   :  { %2211 = vst [vmem:[#allocation8 + $0x10] sm:$0xff] %v2207_v7 }
 0x4b3   :  { %4123 = shalt.err (!%p4120_p0)
}
 0x4b4   :  { %s4124_s30 = scalar_lea.hbm %s4831_s3, 512 }
 0x4b5   :  { %p4125_p1 = scmp.ne.s32.totalorder %s4831_s3, %s4124_s30  ;;  %p4128_p2 = scmp.lt.u32.totalorder %s4124_s30, %s4831_s3 }
 0x4b7   :  { %p4130_p3 = pnand %p4128_p2, %p4125_p1 }
 0x4b9   :  { %4133 = shalt.err (!%p4130_p3)
}
 0x4ba   :  { %2224 = dma.vmem_to_hbm [thread:$0]  %s2219_s26, 512, %s4831_s3, [#allocation4], %s4142_s24, %s4142_s24, %s4143_s25  }
 0x4bb   :  { %4138 = dma.done.wait [#allocation4], 512  }
 0x4bc   :  { %4139 = vsyncadd [#allocation4], 4294966784 }
 0x4bd   :  { %2228 = vsyncpa [#allocation3], 1 }
 0x4be   :  { %2229 = vsyncpa [#allocation6], 1 }
 0x4bf   :  { %2230 = vsyncpa [#allocation4], 1 }

</bundles_post_ra>
